<compile_context>
chip_gen: v7x
topology: tpu7x:2x2x1
jax: 0.10.0
libtpu: 0.0.40
codegen_flags: <defaults>
</compile_context>

<pallas_src>
import functools

import jax
import jax.numpy as jnp
from jax.experimental import pallas as pl
from jax.experimental.pallas import tpu as pltpu


_LANE = 128
_SUBLANE = 8


def _round_up(x, m):
    return ((x + m - 1) // m) * m


# ---------------------------------------------------------------------------
# Fused Pallas kernel: L x (GINEConv + MLP + BN + ReLU) + pool + L2 normalize
# ---------------------------------------------------------------------------

def _encoder_fused_kernel(h0_ref, eattr_ref, src_ref, dst_ref, ew_ref,
                          batch_ref, mask_ref,
                          w1_ref, b1_ref, g1_ref, be1_ref,
                          w2_ref, b2_ref, g2_ref, be2_ref,
                          pool_ref, h_out_ref,
                          *, num_layers, n_real, bn_eps=1e-5):
    n_pad, _ = h0_ref.shape
    e_pad = eattr_ref.shape[0]
    g_pad = pool_ref.shape[0]

    h = h0_ref[...]                      # [Np, Dp] f32 node embeddings
    eattr = eattr_ref[...]               # [Ep, Dp] f32 edge embeddings
    ew = ew_ref[...]                     # [Ep, 1]  f32 edge weights (0 on pad)
    mask = mask_ref[...]                 # [Np, 1]  f32 row mask (real nodes)

    # --- one-hot gather / scatter / pool matrices, built in-VMEM (no HBM) ---
    iota_en = jax.lax.broadcasted_iota(jnp.int32, (e_pad, n_pad), 1)
    src_oh = jnp.where(iota_en == src_ref[...], 1.0, 0.0).astype(jnp.bfloat16)   # [Ep, Np]
    iota_ne = jax.lax.broadcasted_iota(jnp.int32, (n_pad, e_pad), 0)
    dst_oh = jnp.where(iota_ne == dst_ref[...], 1.0, 0.0).astype(jnp.bfloat16)   # [Np, Ep]
    iota_gn = jax.lax.broadcasted_iota(jnp.int32, (g_pad, n_pad), 0)
    pool_oh = jnp.where(iota_gn == batch_ref[...], 1.0, 0.0).astype(jnp.bfloat16)  # [Gp, Np]

    inv_n = 1.0 / n_real

    for layer in range(num_layers):
        w1 = w1_ref[layer]                       # [Dp, Hp] bf16
        w2 = w2_ref[layer]                       # [Hp, Dp] bf16
        b1 = b1_ref[layer]; g1 = g1_ref[layer]; be1 = be1_ref[layer]
        b2 = b2_ref[layer]; g2 = g2_ref[layer]; be2 = be2_ref[layer]

        # --- GINEConv message passing (eps = 0) ---
        x_src = jnp.dot(src_oh, h.astype(jnp.bfloat16),
                        preferred_element_type=jnp.float32)               # [Ep, Dp]
        msg = jnp.maximum(x_src + eattr, 0.0) * ew                        # relu(x_j + e_ij) * w_ij (f32)
        aggr = jnp.dot(dst_oh, msg.astype(jnp.bfloat16),
                       preferred_element_type=jnp.float32)                # [Np, Dp]
        h = h + aggr                                                      # (1+eps)*x + aggr

        # --- GIN MLP: Linear(D,2D) -> BN(2D) -> ReLU -> Linear(2D,D) ---
        h1 = jnp.dot(h.astype(jnp.bfloat16), w1,
                     preferred_element_type=jnp.float32) + b1
        mu1 = jnp.sum(h1 * mask, axis=0, keepdims=True) * inv_n
        var1 = jnp.sum(((h1 - mu1) ** 2) * mask, axis=0, keepdims=True) * inv_n
        scale1 = jax.lax.rsqrt(var1 + bn_eps) * g1                        # fold gamma into scale
        h1 = jnp.maximum(((h1 - mu1) * scale1 + be1) * mask, 0.0)

        h2 = jnp.dot(h1.astype(jnp.bfloat16), w2,
                     preferred_element_type=jnp.float32) + b2

        # --- outer BatchNorm1d(D) ---
        mu2 = jnp.sum(h2 * mask, axis=0, keepdims=True) * inv_n
        var2 = jnp.sum(((h2 - mu2) ** 2) * mask, axis=0, keepdims=True) * inv_n
        scale2 = jax.lax.rsqrt(var2 + bn_eps) * g2
        h2 = ((h2 - mu2) * scale2 + be2) * mask

        if layer != num_layers - 1:
            h2 = jnp.maximum(h2, 0.0)
        # dropout (p = 0.0) is the identity
        h = h2

    h_out_ref[...] = h

    # --- global_add_pool + row-wise L2 normalize (fused epilogue) ---
    xpool = jnp.dot(pool_oh, h.astype(jnp.bfloat16),
                    preferred_element_type=jnp.float32)                   # [Gp, Dp]
    norm_sq = jnp.sum(xpool * xpool, axis=1, keepdims=True)
    inv_norm = jax.lax.rsqrt(jnp.maximum(norm_sq, 1e-24))
    pool_ref[...] = xpool * inv_norm


# ---------------------------------------------------------------------------
# Encoder (GIN backbone, pooling_type='standard')
# ---------------------------------------------------------------------------

class EncoderPallas:
    def __init__(self, emb_dim=32, num_gc_layers=3, num_atom_types=16,
                 num_bond_types=8, seed=0):
        self.emb_dim = emb_dim
        self.num_gc_layers = num_gc_layers
        self.d_pad = _round_up(emb_dim, _LANE)           # lane-padded D
        self.h_pad = _round_up(2 * emb_dim, _LANE)       # lane-padded 2D

        key = jax.random.PRNGKey(seed)
        key, k_atom, k_bond = jax.random.split(key, 3)

        # embedding tables (AtomEncoder / BondEncoder, single feature column)
        self.atom_table = 0.1 * jax.random.normal(
            k_atom, (num_atom_types, emb_dim), jnp.float32)
        self.bond_table = 0.1 * jax.random.normal(
            k_bond, (num_bond_types, emb_dim), jnp.float32)

        def xavier(k, shape):
            fan_in, fan_out = shape
            a = jnp.sqrt(6.0 / (fan_in + fan_out))
            return jax.random.uniform(k, shape, jnp.float32, -a, a)

        hdim = 2 * emb_dim
        w1s, w2s = [], []
        for _ in range(num_gc_layers):
            key, k1, k2 = jax.random.split(key, 3)
            w1 = jnp.zeros((self.d_pad, self.h_pad), jnp.float32)
            w1 = w1.at[:emb_dim, :hdim].set(xavier(k1, (emb_dim, hdim)))
            w2 = jnp.zeros((self.h_pad, self.d_pad), jnp.float32)
            w2 = w2.at[:hdim, :emb_dim].set(xavier(k2, (hdim, emb_dim)))
            w1s.append(w1)
            w2s.append(w2)

        L = num_gc_layers
        # bf16 MXU weights, f32 accumulation inside the kernel
        self.w1 = jnp.stack(w1s).astype(jnp.bfloat16)            # [L, Dp, Hp]
        self.w2 = jnp.stack(w2s).astype(jnp.bfloat16)            # [L, Hp, Dp]
        self.b1 = jnp.zeros((L, 1, self.h_pad), jnp.float32)
        self.be1 = jnp.zeros((L, 1, self.h_pad), jnp.float32)
        self.b2 = jnp.zeros((L, 1, self.d_pad), jnp.float32)
        self.be2 = jnp.zeros((L, 1, self.d_pad), jnp.float32)
        # BN gamma: ones on real feature columns, zeros on padded lanes
        g1 = jnp.zeros((1, self.h_pad), jnp.float32).at[:, :hdim].set(1.0)
        g2 = jnp.zeros((1, self.d_pad), jnp.float32).at[:, :emb_dim].set(1.0)
        self.g1 = jnp.tile(g1[None], (L, 1, 1))
        self.g2 = jnp.tile(g2[None], (L, 1, 1))

    def __call__(self, batch, x, edge_index, edge_attr, edge_weight=None,
                 num_graphs=None):
        """batch: [N] int graph ids, x: [N, 1] int atom ids,
        edge_index: [2, E] int, edge_attr: [E, 1] int, edge_weight: [E, 1] float,
        num_graphs: static python int (avoids a device->host sync)."""
        n = x.shape[0]
        e = edge_index.shape[1]
        d = self.emb_dim
        if num_graphs is None:
            # TODO(synk): prefer passing num_graphs statically; this forces a host sync.
            num_graphs = int(jnp.max(batch)) + 1

        n_pad = _round_up(max(n, _SUBLANE), _SUBLANE)
        e_pad = _round_up(max(e, _SUBLANE), _SUBLANE)
        g_pad = _round_up(max(num_graphs, _SUBLANE), _SUBLANE)
        dp = self.d_pad

        if edge_weight is None:
            edge_weight = jnp.ones((e, 1), jnp.float32)
        edge_weight = jnp.asarray(edge_weight, jnp.float32).reshape(e, 1)

        # glue: embedding lookups (AtomEncoder / BondEncoder)
        h0 = jnp.take(self.atom_table, x[:, 0].astype(jnp.int32), axis=0)          # [N, D]
        ea = jnp.take(self.bond_table, edge_attr[:, 0].astype(jnp.int32), axis=0)  # [E, D]

        # glue: zero/sentinel padding to sublane/lane-aligned shapes
        h0p = jnp.zeros((n_pad, dp), jnp.float32).at[:n, :d].set(h0)
        eap = jnp.zeros((e_pad, dp), jnp.float32).at[:e, :d].set(ea)
        src = jnp.full((e_pad, 1), -1, jnp.int32).at[:e, 0].set(
            edge_index[0].astype(jnp.int32))
        dst = jnp.full((1, e_pad), -1, jnp.int32).at[0, :e].set(
            edge_index[1].astype(jnp.int32))
        ew = jnp.zeros((e_pad, 1), jnp.float32).at[:e].set(edge_weight)
        bidx = jnp.full((1, n_pad), -1, jnp.int32).at[0, :n].set(
            batch.astype(jnp.int32))
        mask = jnp.zeros((n_pad, 1), jnp.float32).at[:n].set(1.0)

        kernel = functools.partial(
            _encoder_fused_kernel,
            num_layers=self.num_gc_layers,
            n_real=float(n))

        vmem = pl.BlockSpec(memory_space=pltpu.MemorySpace.VMEM)
        pool_p, h_p = pl.pallas_call(
            kernel,
            out_shape=(jax.ShapeDtypeStruct((g_pad, dp), jnp.float32),
                       jax.ShapeDtypeStruct((n_pad, dp), jnp.float32)),
            in_specs=[vmem] * 15,
            out_specs=(vmem, vmem),
        )(h0p, eap, src, dst, ew, bidx, mask,
          self.w1, self.b1, self.g1, self.be1,
          self.w2, self.b2, self.g2, self.be2)

        # slice away lane / sublane padding
        return pool_p[:num_graphs, :d], h_p[:n, :d]


# ---------------------------------------------------------------------------
# main
# ---------------------------------------------------------------------------

if __name__ == "__main__":
    key = jax.random.PRNGKey(0)
    k1, k2, k3, k4 = jax.random.split(key, 4)

    N, E, D, L, G = 16, 32, 32, 3, 2
    NUM_ATOM, NUM_BOND = 16, 8

    x = jax.random.randint(k1, (N, 1), 0, NUM_ATOM, dtype=jnp.int32)
    edge_attr = jax.random.randint(k2, (E, 1), 0, NUM_BOND, dtype=jnp.int32)
    edge_index = jnp.stack([
        jax.random.randint(k3, (E,), 0, N, dtype=jnp.int32),
        jax.random.randint(k4, (E,), 0, N, dtype=jnp.int32),
    ], axis=0)
    batch = jnp.concatenate([jnp.zeros((N // 2,), jnp.int32),
                             jnp.ones((N - N // 2,), jnp.int32)])

    enc = EncoderPallas(emb_dim=D, num_gc_layers=L,
                        num_atom_types=NUM_ATOM, num_bond_types=NUM_BOND, seed=0)

    graph_emb, node_emb = enc(batch, x, edge_index, edge_attr,
                              edge_weight=None, num_graphs=G)
    jax.block_until_ready((graph_emb, node_emb))

    assert graph_emb.shape == (G, D)
    assert node_emb.shape == (N, D)
    assert bool(jnp.all(jnp.isfinite(graph_emb)))
    assert bool(jnp.all(jnp.isfinite(node_emb)))
    print("KERNEL_OK")
</pallas_src>

<mosaic_0001>
module attributes {stable_mosaic.version = 11 : i64} {
  func.func @_encoder_fused_kernel(%arg0: memref<16x128xf32, #tpu.memory_space<vmem>>, %arg1: memref<32x128xf32, #tpu.memory_space<vmem>>, %arg2: memref<32x1xi32, #tpu.memory_space<vmem>>, %arg3: memref<1x32xi32, #tpu.memory_space<vmem>>, %arg4: memref<32x1xf32, #tpu.memory_space<vmem>>, %arg5: memref<1x16xi32, #tpu.memory_space<vmem>>, %arg6: memref<16x1xf32, #tpu.memory_space<vmem>>, %arg7: memref<3x128x128xbf16, #tpu.memory_space<vmem>>, %arg8: memref<3x1x128xf32, #tpu.memory_space<vmem>>, %arg9: memref<3x1x128xf32, #tpu.memory_space<vmem>>, %arg10: memref<3x1x128xf32, #tpu.memory_space<vmem>>, %arg11: memref<3x128x128xbf16, #tpu.memory_space<vmem>>, %arg12: memref<3x1x128xf32, #tpu.memory_space<vmem>>, %arg13: memref<3x1x128xf32, #tpu.memory_space<vmem>>, %arg14: memref<3x1x128xf32, #tpu.memory_space<vmem>>, %arg15: memref<8x128xf32, #tpu.memory_space<vmem>>, %arg16: memref<16x128xf32, #tpu.memory_space<vmem>>) attributes {dimension_semantics = [], scalar_prefetch = 0 : i64, scratch_operands = 0 : i64, tpu.core_type = #tpu.core_type<tc>} {
    %c0 = arith.constant 0 : index
    %c0_0 = arith.constant 0 : index
    %0 = vector.load %arg0[%c0, %c0_0] : memref<16x128xf32, #tpu.memory_space<vmem>>, vector<16x128xf32>
    %c0_1 = arith.constant 0 : index
    %c0_2 = arith.constant 0 : index
    %1 = vector.load %arg1[%c0_1, %c0_2] : memref<32x128xf32, #tpu.memory_space<vmem>>, vector<32x128xf32>
    %c0_3 = arith.constant 0 : index
    %c0_4 = arith.constant 0 : index
    %2 = vector.load %arg4[%c0_3, %c0_4] : memref<32x1xf32, #tpu.memory_space<vmem>>, vector<32x1xf32>
    %c0_5 = arith.constant 0 : index
    %c0_6 = arith.constant 0 : index
    %3 = vector.load %arg6[%c0_5, %c0_6] : memref<16x1xf32, #tpu.memory_space<vmem>>, vector<16x1xf32>
    %4 = tpu.iota {dimensions = array<i32: 1>} : vector<32x16xi32>
    %c0_7 = arith.constant 0 : index
    %c0_8 = arith.constant 0 : index
    %5 = vector.load %arg2[%c0_7, %c0_8] : memref<32x1xi32, #tpu.memory_space<vmem>>, vector<32x1xi32>
    %6 = vector.broadcast %5 : vector<32x1xi32> to vector<32x16xi32>
    %7 = arith.cmpi eq, %4, %6 : vector<32x16xi32>
    %cst = arith.constant 1.000000e+00 : f32
    %cst_9 = arith.constant 0.000000e+00 : f32
    %8 = vector.broadcast %cst : f32 to vector<32x16xf32>
    %9 = vector.broadcast %cst_9 : f32 to vector<32x16xf32>
    %10 = arith.select %7, %8, %9 : vector<32x16xi1>, vector<32x16xf32>
    %11 = arith.truncf %10 : vector<32x16xf32> to vector<32x16xbf16>
    %12 = tpu.iota {dimensions = array<i32: 0>} : vector<16x32xi32>
    %c0_10 = arith.constant 0 : index
    %c0_11 = arith.constant 0 : index
    %13 = vector.load %arg3[%c0_10, %c0_11] : memref<1x32xi32, #tpu.memory_space<vmem>>, vector<1x32xi32>
    %14 = vector.broadcast %13 : vector<1x32xi32> to vector<16x32xi32>
    %15 = arith.cmpi eq, %12, %14 : vector<16x32xi32>
    %cst_12 = arith.constant 1.000000e+00 : f32
    %cst_13 = arith.constant 0.000000e+00 : f32
    %16 = vector.broadcast %cst_12 : f32 to vector<16x32xf32>
    %17 = vector.broadcast %cst_13 : f32 to vector<16x32xf32>
    %18 = arith.select %15, %16, %17 : vector<16x32xi1>, vector<16x32xf32>
    %19 = arith.truncf %18 : vector<16x32xf32> to vector<16x32xbf16>
    %20 = tpu.iota {dimensions = array<i32: 0>} : vector<8x16xi32>
    %c0_14 = arith.constant 0 : index
    %c0_15 = arith.constant 0 : index
    %21 = vector.load %arg5[%c0_14, %c0_15] : memref<1x16xi32, #tpu.memory_space<vmem>>, vector<1x16xi32>
    %22 = vector.broadcast %21 : vector<1x16xi32> to vector<8x16xi32>
    %23 = arith.cmpi eq, %20, %22 : vector<8x16xi32>
    %cst_16 = arith.constant 1.000000e+00 : f32
    %cst_17 = arith.constant 0.000000e+00 : f32
    %24 = vector.broadcast %cst_16 : f32 to vector<8x16xf32>
    %25 = vector.broadcast %cst_17 : f32 to vector<8x16xf32>
    %26 = arith.select %23, %24, %25 : vector<8x16xi1>, vector<8x16xf32>
    %27 = arith.truncf %26 : vector<8x16xf32> to vector<8x16xbf16>
    %c0_18 = arith.constant 0 : index
    %c0_19 = arith.constant 0 : index
    %c0_20 = arith.constant 0 : index
    %28 = vector.load %arg7[%c0_18, %c0_19, %c0_20] : memref<3x128x128xbf16, #tpu.memory_space<vmem>>, vector<1x128x128xbf16>
    %29 = vector.shape_cast %28 : vector<1x128x128xbf16> to vector<128x128xbf16>
    %c0_21 = arith.constant 0 : index
    %c0_22 = arith.constant 0 : index
    %c0_23 = arith.constant 0 : index
    %30 = vector.load %arg11[%c0_21, %c0_22, %c0_23] : memref<3x128x128xbf16, #tpu.memory_space<vmem>>, vector<1x128x128xbf16>
    %31 = vector.shape_cast %30 : vector<1x128x128xbf16> to vector<128x128xbf16>
    %c0_24 = arith.constant 0 : index
    %c0_25 = arith.constant 0 : index
    %c0_26 = arith.constant 0 : index
    %32 = vector.load %arg8[%c0_24, %c0_25, %c0_26] : memref<3x1x128xf32, #tpu.memory_space<vmem>>, vector<1x1x128xf32>
    %33 = vector.shape_cast %32 : vector<1x1x128xf32> to vector<1x128xf32>
    %c0_27 = arith.constant 0 : index
    %c0_28 = arith.constant 0 : index
    %c0_29 = arith.constant 0 : index
    %34 = vector.load %arg9[%c0_27, %c0_28, %c0_29] : memref<3x1x128xf32, #tpu.memory_space<vmem>>, vector<1x1x128xf32>
    %35 = vector.shape_cast %34 : vector<1x1x128xf32> to vector<1x128xf32>
    %c0_30 = arith.constant 0 : index
    %c0_31 = arith.constant 0 : index
    %c0_32 = arith.constant 0 : index
    %36 = vector.load %arg10[%c0_30, %c0_31, %c0_32] : memref<3x1x128xf32, #tpu.memory_space<vmem>>, vector<1x1x128xf32>
    %37 = vector.shape_cast %36 : vector<1x1x128xf32> to vector<1x128xf32>
    %c0_33 = arith.constant 0 : index
    %c0_34 = arith.constant 0 : index
    %c0_35 = arith.constant 0 : index
    %38 = vector.load %arg12[%c0_33, %c0_34, %c0_35] : memref<3x1x128xf32, #tpu.memory_space<vmem>>, vector<1x1x128xf32>
    %39 = vector.shape_cast %38 : vector<1x1x128xf32> to vector<1x128xf32>
    %c0_36 = arith.constant 0 : index
    %c0_37 = arith.constant 0 : index
    %c0_38 = arith.constant 0 : index
    %40 = vector.load %arg13[%c0_36, %c0_37, %c0_38] : memref<3x1x128xf32, #tpu.memory_space<vmem>>, vector<1x1x128xf32>
    %41 = vector.shape_cast %40 : vector<1x1x128xf32> to vector<1x128xf32>
    %c0_39 = arith.constant 0 : index
    %c0_40 = arith.constant 0 : index
    %c0_41 = arith.constant 0 : index
    %42 = vector.load %arg14[%c0_39, %c0_40, %c0_41] : memref<3x1x128xf32, #tpu.memory_space<vmem>>, vector<1x1x128xf32>
    %43 = vector.shape_cast %42 : vector<1x1x128xf32> to vector<1x128xf32>
    %44 = arith.truncf %0 : vector<16x128xf32> to vector<16x128xbf16>
    %cst_42 = arith.constant dense<0.000000e+00> : vector<32x128xf32>
    %45 = tpu.matmul %11, %44, %cst_42 {dimension_numbers = #tpu.dot_dimension_numbers<[1], [0], [0], [1], [0, 0, 1, 1], [], []>} : vector<32x16xbf16>, vector<16x128xbf16>, vector<32x128xf32> -> vector<32x128xf32>
    %46 = arith.addf %45, %1 : vector<32x128xf32>
    %cst_43 = arith.constant 0.000000e+00 : f32
    %47 = vector.broadcast %cst_43 : f32 to vector<32x128xf32>
    %48 = arith.maximumf %46, %47 : vector<32x128xf32>
    %49 = vector.broadcast %2 : vector<32x1xf32> to vector<32x128xf32>
    %50 = arith.mulf %48, %49 : vector<32x128xf32>
    %51 = arith.truncf %50 : vector<32x128xf32> to vector<32x128xbf16>
    %cst_44 = arith.constant dense<0.000000e+00> : vector<16x128xf32>
    %52 = tpu.matmul %19, %51, %cst_44 {dimension_numbers = #tpu.dot_dimension_numbers<[1], [0], [0], [1], [0, 0, 1, 1], [], []>} : vector<16x32xbf16>, vector<32x128xbf16>, vector<16x128xf32> -> vector<16x128xf32>
    %53 = arith.addf %0, %52 : vector<16x128xf32>
    %54 = arith.truncf %53 : vector<16x128xf32> to vector<16x128xbf16>
    %cst_45 = arith.constant dense<0.000000e+00> : vector<16x128xf32>
    %55 = tpu.matmul %54, %29, %cst_45 {dimension_numbers = #tpu.dot_dimension_numbers<[1], [0], [0], [1], [0, 0, 1, 1], [], []>} : vector<16x128xbf16>, vector<128x128xbf16>, vector<16x128xf32> -> vector<16x128xf32>
    %56 = vector.broadcast %33 : vector<1x128xf32> to vector<16x128xf32>
    %57 = arith.addf %55, %56 : vector<16x128xf32>
    %58 = vector.broadcast %3 : vector<16x1xf32> to vector<16x128xf32>
    %59 = arith.mulf %57, %58 : vector<16x128xf32>
    %cst_46 = arith.constant dense<0.000000e+00> : vector<128xf32>
    %60 = vector.multi_reduction <add>, %59, %cst_46 [0] : vector<16x128xf32> to vector<128xf32>
    %61 = vector.shape_cast %60 : vector<128xf32> to vector<1x128xf32>
    %cst_47 = arith.constant 6.250000e-02 : f32
    %62 = vector.broadcast %cst_47 : f32 to vector<1x128xf32>
    %63 = arith.mulf %61, %62 : vector<1x128xf32>
    %64 = vector.broadcast %63 : vector<1x128xf32> to vector<16x128xf32>
    %65 = arith.subf %57, %64 : vector<16x128xf32>
    %66 = arith.mulf %65, %65 : vector<16x128xf32>
    %67 = vector.broadcast %3 : vector<16x1xf32> to vector<16x128xf32>
    %68 = arith.mulf %66, %67 : vector<16x128xf32>
    %cst_48 = arith.constant dense<0.000000e+00> : vector<128xf32>
    %69 = vector.multi_reduction <add>, %68, %cst_48 [0] : vector<16x128xf32> to vector<128xf32>
    %70 = vector.shape_cast %69 : vector<128xf32> to vector<1x128xf32>
    %cst_49 = arith.constant 6.250000e-02 : f32
    %71 = vector.broadcast %cst_49 : f32 to vector<1x128xf32>
    %72 = arith.mulf %70, %71 : vector<1x128xf32>
    %cst_50 = arith.constant 9.99999974E-6 : f32
    %73 = vector.broadcast %cst_50 : f32 to vector<1x128xf32>
    %74 = arith.addf %72, %73 : vector<1x128xf32>
    %75 = math.rsqrt %74 : vector<1x128xf32>
    %76 = arith.mulf %75, %35 : vector<1x128xf32>
    %77 = vector.broadcast %63 : vector<1x128xf32> to vector<16x128xf32>
    %78 = arith.subf %57, %77 : vector<16x128xf32>
    %79 = vector.broadcast %76 : vector<1x128xf32> to vector<16x128xf32>
    %80 = arith.mulf %78, %79 : vector<16x128xf32>
    %81 = vector.broadcast %37 : vector<1x128xf32> to vector<16x128xf32>
    %82 = arith.addf %80, %81 : vector<16x128xf32>
    %83 = vector.broadcast %3 : vector<16x1xf32> to vector<16x128xf32>
    %84 = arith.mulf %82, %83 : vector<16x128xf32>
    %cst_51 = arith.constant 0.000000e+00 : f32
    %85 = vector.broadcast %cst_51 : f32 to vector<16x128xf32>
    %86 = arith.maximumf %84, %85 : vector<16x128xf32>
    %87 = arith.truncf %86 : vector<16x128xf32> to vector<16x128xbf16>
    %cst_52 = arith.constant dense<0.000000e+00> : vector<16x128xf32>
    %88 = tpu.matmul %87, %31, %cst_52 {dimension_numbers = #tpu.dot_dimension_numbers<[1], [0], [0], [1], [0, 0, 1, 1], [], []>} : vector<16x128xbf16>, vector<128x128xbf16>, vector<16x128xf32> -> vector<16x128xf32>
    %89 = vector.broadcast %39 : vector<1x128xf32> to vector<16x128xf32>
    %90 = arith.addf %88, %89 : vector<16x128xf32>
    %91 = vector.broadcast %3 : vector<16x1xf32> to vector<16x128xf32>
    %92 = arith.mulf %90, %91 : vector<16x128xf32>
    %cst_53 = arith.constant dense<0.000000e+00> : vector<128xf32>
    %93 = vector.multi_reduction <add>, %92, %cst_53 [0] : vector<16x128xf32> to vector<128xf32>
    %94 = vector.shape_cast %93 : vector<128xf32> to vector<1x128xf32>
    %cst_54 = arith.constant 6.250000e-02 : f32
    %95 = vector.broadcast %cst_54 : f32 to vector<1x128xf32>
    %96 = arith.mulf %94, %95 : vector<1x128xf32>
    %97 = vector.broadcast %96 : vector<1x128xf32> to vector<16x128xf32>
    %98 = arith.subf %90, %97 : vector<16x128xf32>
    %99 = arith.mulf %98, %98 : vector<16x128xf32>
    %100 = vector.broadcast %3 : vector<16x1xf32> to vector<16x128xf32>
    %101 = arith.mulf %99, %100 : vector<16x128xf32>
    %cst_55 = arith.constant dense<0.000000e+00> : vector<128xf32>
    %102 = vector.multi_reduction <add>, %101, %cst_55 [0] : vector<16x128xf32> to vector<128xf32>
    %103 = vector.shape_cast %102 : vector<128xf32> to vector<1x128xf32>
    %cst_56 = arith.constant 6.250000e-02 : f32
    %104 = vector.broadcast %cst_56 : f32 to vector<1x128xf32>
    %105 = arith.mulf %103, %104 : vector<1x128xf32>
    %cst_57 = arith.constant 9.99999974E-6 : f32
    %106 = vector.broadcast %cst_57 : f32 to vector<1x128xf32>
    %107 = arith.addf %105, %106 : vector<1x128xf32>
    %108 = math.rsqrt %107 : vector<1x128xf32>
    %109 = arith.mulf %108, %41 : vector<1x128xf32>
    %110 = vector.broadcast %96 : vector<1x128xf32> to vector<16x128xf32>
    %111 = arith.subf %90, %110 : vector<16x128xf32>
    %112 = vector.broadcast %109 : vector<1x128xf32> to vector<16x128xf32>
    %113 = arith.mulf %111, %112 : vector<16x128xf32>
    %114 = vector.broadcast %43 : vector<1x128xf32> to vector<16x128xf32>
    %115 = arith.addf %113, %114 : vector<16x128xf32>
    %116 = vector.broadcast %3 : vector<16x1xf32> to vector<16x128xf32>
    %117 = arith.mulf %115, %116 : vector<16x128xf32>
    %cst_58 = arith.constant 0.000000e+00 : f32
    %118 = vector.broadcast %cst_58 : f32 to vector<16x128xf32>
    %119 = arith.maximumf %117, %118 : vector<16x128xf32>
    %c1 = arith.constant 1 : index
    %c0_59 = arith.constant 0 : index
    %c0_60 = arith.constant 0 : index
    %120 = vector.load %arg7[%c1, %c0_59, %c0_60] : memref<3x128x128xbf16, #tpu.memory_space<vmem>>, vector<1x128x128xbf16>
    %121 = vector.shape_cast %120 : vector<1x128x128xbf16> to vector<128x128xbf16>
    %c1_61 = arith.constant 1 : index
    %c0_62 = arith.constant 0 : index
    %c0_63 = arith.constant 0 : index
    %122 = vector.load %arg11[%c1_61, %c0_62, %c0_63] : memref<3x128x128xbf16, #tpu.memory_space<vmem>>, vector<1x128x128xbf16>
    %123 = vector.shape_cast %122 : vector<1x128x128xbf16> to vector<128x128xbf16>
    %c1_64 = arith.constant 1 : index
    %c0_65 = arith.constant 0 : index
    %c0_66 = arith.constant 0 : index
    %124 = vector.load %arg8[%c1_64, %c0_65, %c0_66] : memref<3x1x128xf32, #tpu.memory_space<vmem>>, vector<1x1x128xf32>
    %125 = vector.shape_cast %124 : vector<1x1x128xf32> to vector<1x128xf32>
    %c1_67 = arith.constant 1 : index
    %c0_68 = arith.constant 0 : index
    %c0_69 = arith.constant 0 : index
    %126 = vector.load %arg9[%c1_67, %c0_68, %c0_69] : memref<3x1x128xf32, #tpu.memory_space<vmem>>, vector<1x1x128xf32>
    %127 = vector.shape_cast %126 : vector<1x1x128xf32> to vector<1x128xf32>
    %c1_70 = arith.constant 1 : index
    %c0_71 = arith.constant 0 : index
    %c0_72 = arith.constant 0 : index
    %128 = vector.load %arg10[%c1_70, %c0_71, %c0_72] : memref<3x1x128xf32, #tpu.memory_space<vmem>>, vector<1x1x128xf32>
    %129 = vector.shape_cast %128 : vector<1x1x128xf32> to vector<1x128xf32>
    %c1_73 = arith.constant 1 : index
    %c0_74 = arith.constant 0 : index
    %c0_75 = arith.constant 0 : index
    %130 = vector.load %arg12[%c1_73, %c0_74, %c0_75] : memref<3x1x128xf32, #tpu.memory_space<vmem>>, vector<1x1x128xf32>
    %131 = vector.shape_cast %130 : vector<1x1x128xf32> to vector<1x128xf32>
    %c1_76 = arith.constant 1 : index
    %c0_77 = arith.constant 0 : index
    %c0_78 = arith.constant 0 : index
    %132 = vector.load %arg13[%c1_76, %c0_77, %c0_78] : memref<3x1x128xf32, #tpu.memory_space<vmem>>, vector<1x1x128xf32>
    %133 = vector.shape_cast %132 : vector<1x1x128xf32> to vector<1x128xf32>
    %c1_79 = arith.constant 1 : index
    %c0_80 = arith.constant 0 : index
    %c0_81 = arith.constant 0 : index
    %134 = vector.load %arg14[%c1_79, %c0_80, %c0_81] : memref<3x1x128xf32, #tpu.memory_space<vmem>>, vector<1x1x128xf32>
    %135 = vector.shape_cast %134 : vector<1x1x128xf32> to vector<1x128xf32>
    %136 = arith.truncf %119 : vector<16x128xf32> to vector<16x128xbf16>
    %cst_82 = arith.constant dense<0.000000e+00> : vector<32x128xf32>
    %137 = tpu.matmul %11, %136, %cst_82 {dimension_numbers = #tpu.dot_dimension_numbers<[1], [0], [0], [1], [0, 0, 1, 1], [], []>} : vector<32x16xbf16>, vector<16x128xbf16>, vector<32x128xf32> -> vector<32x128xf32>
    %138 = arith.addf %137, %1 : vector<32x128xf32>
    %cst_83 = arith.constant 0.000000e+00 : f32
    %139 = vector.broadcast %cst_83 : f32 to vector<32x128xf32>
    %140 = arith.maximumf %138, %139 : vector<32x128xf32>
    %141 = vector.broadcast %2 : vector<32x1xf32> to vector<32x128xf32>
    %142 = arith.mulf %140, %141 : vector<32x128xf32>
    %143 = arith.truncf %142 : vector<32x128xf32> to vector<32x128xbf16>
    %cst_84 = arith.constant dense<0.000000e+00> : vector<16x128xf32>
    %144 = tpu.matmul %19, %143, %cst_84 {dimension_numbers = #tpu.dot_dimension_numbers<[1], [0], [0], [1], [0, 0, 1, 1], [], []>} : vector<16x32xbf16>, vector<32x128xbf16>, vector<16x128xf32> -> vector<16x128xf32>
    %145 = arith.addf %119, %144 : vector<16x128xf32>
    %146 = arith.truncf %145 : vector<16x128xf32> to vector<16x128xbf16>
    %cst_85 = arith.constant dense<0.000000e+00> : vector<16x128xf32>
    %147 = tpu.matmul %146, %121, %cst_85 {dimension_numbers = #tpu.dot_dimension_numbers<[1], [0], [0], [1], [0, 0, 1, 1], [], []>} : vector<16x128xbf16>, vector<128x128xbf16>, vector<16x128xf32> -> vector<16x128xf32>
    %148 = vector.broadcast %125 : vector<1x128xf32> to vector<16x128xf32>
    %149 = arith.addf %147, %148 : vector<16x128xf32>
    %150 = vector.broadcast %3 : vector<16x1xf32> to vector<16x128xf32>
    %151 = arith.mulf %149, %150 : vector<16x128xf32>
    %cst_86 = arith.constant dense<0.000000e+00> : vector<128xf32>
    %152 = vector.multi_reduction <add>, %151, %cst_86 [0] : vector<16x128xf32> to vector<128xf32>
    %153 = vector.shape_cast %152 : vector<128xf32> to vector<1x128xf32>
    %cst_87 = arith.constant 6.250000e-02 : f32
    %154 = vector.broadcast %cst_87 : f32 to vector<1x128xf32>
    %155 = arith.mulf %153, %154 : vector<1x128xf32>
    %156 = vector.broadcast %155 : vector<1x128xf32> to vector<16x128xf32>
    %157 = arith.subf %149, %156 : vector<16x128xf32>
    %158 = arith.mulf %157, %157 : vector<16x128xf32>
    %159 = vector.broadcast %3 : vector<16x1xf32> to vector<16x128xf32>
    %160 = arith.mulf %158, %159 : vector<16x128xf32>
    %cst_88 = arith.constant dense<0.000000e+00> : vector<128xf32>
    %161 = vector.multi_reduction <add>, %160, %cst_88 [0] : vector<16x128xf32> to vector<128xf32>
    %162 = vector.shape_cast %161 : vector<128xf32> to vector<1x128xf32>
    %cst_89 = arith.constant 6.250000e-02 : f32
    %163 = vector.broadcast %cst_89 : f32 to vector<1x128xf32>
    %164 = arith.mulf %162, %163 : vector<1x128xf32>
    %cst_90 = arith.constant 9.99999974E-6 : f32
    %165 = vector.broadcast %cst_90 : f32 to vector<1x128xf32>
    %166 = arith.addf %164, %165 : vector<1x128xf32>
    %167 = math.rsqrt %166 : vector<1x128xf32>
    %168 = arith.mulf %167, %127 : vector<1x128xf32>
    %169 = vector.broadcast %155 : vector<1x128xf32> to vector<16x128xf32>
    %170 = arith.subf %149, %169 : vector<16x128xf32>
    %171 = vector.broadcast %168 : vector<1x128xf32> to vector<16x128xf32>
    %172 = arith.mulf %170, %171 : vector<16x128xf32>
    %173 = vector.broadcast %129 : vector<1x128xf32> to vector<16x128xf32>
    %174 = arith.addf %172, %173 : vector<16x128xf32>
    %175 = vector.broadcast %3 : vector<16x1xf32> to vector<16x128xf32>
    %176 = arith.mulf %174, %175 : vector<16x128xf32>
    %cst_91 = arith.constant 0.000000e+00 : f32
    %177 = vector.broadcast %cst_91 : f32 to vector<16x128xf32>
    %178 = arith.maximumf %176, %177 : vector<16x128xf32>
    %179 = arith.truncf %178 : vector<16x128xf32> to vector<16x128xbf16>
    %cst_92 = arith.constant dense<0.000000e+00> : vector<16x128xf32>
    %180 = tpu.matmul %179, %123, %cst_92 {dimension_numbers = #tpu.dot_dimension_numbers<[1], [0], [0], [1], [0, 0, 1, 1], [], []>} : vector<16x128xbf16>, vector<128x128xbf16>, vector<16x128xf32> -> vector<16x128xf32>
    %181 = vector.broadcast %131 : vector<1x128xf32> to vector<16x128xf32>
    %182 = arith.addf %180, %181 : vector<16x128xf32>
    %183 = vector.broadcast %3 : vector<16x1xf32> to vector<16x128xf32>
    %184 = arith.mulf %182, %183 : vector<16x128xf32>
    %cst_93 = arith.constant dense<0.000000e+00> : vector<128xf32>
    %185 = vector.multi_reduction <add>, %184, %cst_93 [0] : vector<16x128xf32> to vector<128xf32>
    %186 = vector.shape_cast %185 : vector<128xf32> to vector<1x128xf32>
    %cst_94 = arith.constant 6.250000e-02 : f32
    %187 = vector.broadcast %cst_94 : f32 to vector<1x128xf32>
    %188 = arith.mulf %186, %187 : vector<1x128xf32>
    %189 = vector.broadcast %188 : vector<1x128xf32> to vector<16x128xf32>
    %190 = arith.subf %182, %189 : vector<16x128xf32>
    %191 = arith.mulf %190, %190 : vector<16x128xf32>
    %192 = vector.broadcast %3 : vector<16x1xf32> to vector<16x128xf32>
    %193 = arith.mulf %191, %192 : vector<16x128xf32>
    %cst_95 = arith.constant dense<0.000000e+00> : vector<128xf32>
    %194 = vector.multi_reduction <add>, %193, %cst_95 [0] : vector<16x128xf32> to vector<128xf32>
    %195 = vector.shape_cast %194 : vector<128xf32> to vector<1x128xf32>
    %cst_96 = arith.constant 6.250000e-02 : f32
    %196 = vector.broadcast %cst_96 : f32 to vector<1x128xf32>
    %197 = arith.mulf %195, %196 : vector<1x128xf32>
    %cst_97 = arith.constant 9.99999974E-6 : f32
    %198 = vector.broadcast %cst_97 : f32 to vector<1x128xf32>
    %199 = arith.addf %197, %198 : vector<1x128xf32>
    %200 = math.rsqrt %199 : vector<1x128xf32>
    %201 = arith.mulf %200, %133 : vector<1x128xf32>
    %202 = vector.broadcast %188 : vector<1x128xf32> to vector<16x128xf32>
    %203 = arith.subf %182, %202 : vector<16x128xf32>
    %204 = vector.broadcast %201 : vector<1x128xf32> to vector<16x128xf32>
    %205 = arith.mulf %203, %204 : vector<16x128xf32>
    %206 = vector.broadcast %135 : vector<1x128xf32> to vector<16x128xf32>
    %207 = arith.addf %205, %206 : vector<16x128xf32>
    %208 = vector.broadcast %3 : vector<16x1xf32> to vector<16x128xf32>
    %209 = arith.mulf %207, %208 : vector<16x128xf32>
    %cst_98 = arith.constant 0.000000e+00 : f32
    %210 = vector.broadcast %cst_98 : f32 to vector<16x128xf32>
    %211 = arith.maximumf %209, %210 : vector<16x128xf32>
    %c2 = arith.constant 2 : index
    %c0_99 = arith.constant 0 : index
    %c0_100 = arith.constant 0 : index
    %212 = vector.load %arg7[%c2, %c0_99, %c0_100] : memref<3x128x128xbf16, #tpu.memory_space<vmem>>, vector<1x128x128xbf16>
    %213 = vector.shape_cast %212 : vector<1x128x128xbf16> to vector<128x128xbf16>
    %c2_101 = arith.constant 2 : index
    %c0_102 = arith.constant 0 : index
    %c0_103 = arith.constant 0 : index
    %214 = vector.load %arg11[%c2_101, %c0_102, %c0_103] : memref<3x128x128xbf16, #tpu.memory_space<vmem>>, vector<1x128x128xbf16>
    %215 = vector.shape_cast %214 : vector<1x128x128xbf16> to vector<128x128xbf16>
    %c2_104 = arith.constant 2 : index
    %c0_105 = arith.constant 0 : index
    %c0_106 = arith.constant 0 : index
    %216 = vector.load %arg8[%c2_104, %c0_105, %c0_106] : memref<3x1x128xf32, #tpu.memory_space<vmem>>, vector<1x1x128xf32>
    %217 = vector.shape_cast %216 : vector<1x1x128xf32> to vector<1x128xf32>
    %c2_107 = arith.constant 2 : index
    %c0_108 = arith.constant 0 : index
    %c0_109 = arith.constant 0 : index
    %218 = vector.load %arg9[%c2_107, %c0_108, %c0_109] : memref<3x1x128xf32, #tpu.memory_space<vmem>>, vector<1x1x128xf32>
    %219 = vector.shape_cast %218 : vector<1x1x128xf32> to vector<1x128xf32>
    %c2_110 = arith.constant 2 : index
    %c0_111 = arith.constant 0 : index
    %c0_112 = arith.constant 0 : index
    %220 = vector.load %arg10[%c2_110, %c0_111, %c0_112] : memref<3x1x128xf32, #tpu.memory_space<vmem>>, vector<1x1x128xf32>
    %221 = vector.shape_cast %220 : vector<1x1x128xf32> to vector<1x128xf32>
    %c2_113 = arith.constant 2 : index
    %c0_114 = arith.constant 0 : index
    %c0_115 = arith.constant 0 : index
    %222 = vector.load %arg12[%c2_113, %c0_114, %c0_115] : memref<3x1x128xf32, #tpu.memory_space<vmem>>, vector<1x1x128xf32>
    %223 = vector.shape_cast %222 : vector<1x1x128xf32> to vector<1x128xf32>
    %c2_116 = arith.constant 2 : index
    %c0_117 = arith.constant 0 : index
    %c0_118 = arith.constant 0 : index
    %224 = vector.load %arg13[%c2_116, %c0_117, %c0_118] : memref<3x1x128xf32, #tpu.memory_space<vmem>>, vector<1x1x128xf32>
    %225 = vector.shape_cast %224 : vector<1x1x128xf32> to vector<1x128xf32>
    %c2_119 = arith.constant 2 : index
    %c0_120 = arith.constant 0 : index
    %c0_121 = arith.constant 0 : index
    %226 = vector.load %arg14[%c2_119, %c0_120, %c0_121] : memref<3x1x128xf32, #tpu.memory_space<vmem>>, vector<1x1x128xf32>
    %227 = vector.shape_cast %226 : vector<1x1x128xf32> to vector<1x128xf32>
    %228 = arith.truncf %211 : vector<16x128xf32> to vector<16x128xbf16>
    %cst_122 = arith.constant dense<0.000000e+00> : vector<32x128xf32>
    %229 = tpu.matmul %11, %228, %cst_122 {dimension_numbers = #tpu.dot_dimension_numbers<[1], [0], [0], [1], [0, 0, 1, 1], [], []>} : vector<32x16xbf16>, vector<16x128xbf16>, vector<32x128xf32> -> vector<32x128xf32>
    %230 = arith.addf %229, %1 : vector<32x128xf32>
    %cst_123 = arith.constant 0.000000e+00 : f32
    %231 = vector.broadcast %cst_123 : f32 to vector<32x128xf32>
    %232 = arith.maximumf %230, %231 : vector<32x128xf32>
    %233 = vector.broadcast %2 : vector<32x1xf32> to vector<32x128xf32>
    %234 = arith.mulf %232, %233 : vector<32x128xf32>
    %235 = arith.truncf %234 : vector<32x128xf32> to vector<32x128xbf16>
    %cst_124 = arith.constant dense<0.000000e+00> : vector<16x128xf32>
    %236 = tpu.matmul %19, %235, %cst_124 {dimension_numbers = #tpu.dot_dimension_numbers<[1], [0], [0], [1], [0, 0, 1, 1], [], []>} : vector<16x32xbf16>, vector<32x128xbf16>, vector<16x128xf32> -> vector<16x128xf32>
    %237 = arith.addf %211, %236 : vector<16x128xf32>
    %238 = arith.truncf %237 : vector<16x128xf32> to vector<16x128xbf16>
    %cst_125 = arith.constant dense<0.000000e+00> : vector<16x128xf32>
    %239 = tpu.matmul %238, %213, %cst_125 {dimension_numbers = #tpu.dot_dimension_numbers<[1], [0], [0], [1], [0, 0, 1, 1], [], []>} : vector<16x128xbf16>, vector<128x128xbf16>, vector<16x128xf32> -> vector<16x128xf32>
    %240 = vector.broadcast %217 : vector<1x128xf32> to vector<16x128xf32>
    %241 = arith.addf %239, %240 : vector<16x128xf32>
    %242 = vector.broadcast %3 : vector<16x1xf32> to vector<16x128xf32>
    %243 = arith.mulf %241, %242 : vector<16x128xf32>
    %cst_126 = arith.constant dense<0.000000e+00> : vector<128xf32>
    %244 = vector.multi_reduction <add>, %243, %cst_126 [0] : vector<16x128xf32> to vector<128xf32>
    %245 = vector.shape_cast %244 : vector<128xf32> to vector<1x128xf32>
    %cst_127 = arith.constant 6.250000e-02 : f32
    %246 = vector.broadcast %cst_127 : f32 to vector<1x128xf32>
    %247 = arith.mulf %245, %246 : vector<1x128xf32>
    %248 = vector.broadcast %247 : vector<1x128xf32> to vector<16x128xf32>
    %249 = arith.subf %241, %248 : vector<16x128xf32>
    %250 = arith.mulf %249, %249 : vector<16x128xf32>
    %251 = vector.broadcast %3 : vector<16x1xf32> to vector<16x128xf32>
    %252 = arith.mulf %250, %251 : vector<16x128xf32>
    %cst_128 = arith.constant dense<0.000000e+00> : vector<128xf32>
    %253 = vector.multi_reduction <add>, %252, %cst_128 [0] : vector<16x128xf32> to vector<128xf32>
    %254 = vector.shape_cast %253 : vector<128xf32> to vector<1x128xf32>
    %cst_129 = arith.constant 6.250000e-02 : f32
    %255 = vector.broadcast %cst_129 : f32 to vector<1x128xf32>
    %256 = arith.mulf %254, %255 : vector<1x128xf32>
    %cst_130 = arith.constant 9.99999974E-6 : f32
    %257 = vector.broadcast %cst_130 : f32 to vector<1x128xf32>
    %258 = arith.addf %256, %257 : vector<1x128xf32>
    %259 = math.rsqrt %258 : vector<1x128xf32>
    %260 = arith.mulf %259, %219 : vector<1x128xf32>
    %261 = vector.broadcast %247 : vector<1x128xf32> to vector<16x128xf32>
    %262 = arith.subf %241, %261 : vector<16x128xf32>
    %263 = vector.broadcast %260 : vector<1x128xf32> to vector<16x128xf32>
    %264 = arith.mulf %262, %263 : vector<16x128xf32>
    %265 = vector.broadcast %221 : vector<1x128xf32> to vector<16x128xf32>
    %266 = arith.addf %264, %265 : vector<16x128xf32>
    %267 = vector.broadcast %3 : vector<16x1xf32> to vector<16x128xf32>
    %268 = arith.mulf %266, %267 : vector<16x128xf32>
    %cst_131 = arith.constant 0.000000e+00 : f32
    %269 = vector.broadcast %cst_131 : f32 to vector<16x128xf32>
    %270 = arith.maximumf %268, %269 : vector<16x128xf32>
    %271 = arith.truncf %270 : vector<16x128xf32> to vector<16x128xbf16>
    %cst_132 = arith.constant dense<0.000000e+00> : vector<16x128xf32>
    %272 = tpu.matmul %271, %215, %cst_132 {dimension_numbers = #tpu.dot_dimension_numbers<[1], [0], [0], [1], [0, 0, 1, 1], [], []>} : vector<16x128xbf16>, vector<128x128xbf16>, vector<16x128xf32> -> vector<16x128xf32>
    %273 = vector.broadcast %223 : vector<1x128xf32> to vector<16x128xf32>
    %274 = arith.addf %272, %273 : vector<16x128xf32>
    %275 = vector.broadcast %3 : vector<16x1xf32> to vector<16x128xf32>
    %276 = arith.mulf %274, %275 : vector<16x128xf32>
    %cst_133 = arith.constant dense<0.000000e+00> : vector<128xf32>
    %277 = vector.multi_reduction <add>, %276, %cst_133 [0] : vector<16x128xf32> to vector<128xf32>
    %278 = vector.shape_cast %277 : vector<128xf32> to vector<1x128xf32>
    %cst_134 = arith.constant 6.250000e-02 : f32
    %279 = vector.broadcast %cst_134 : f32 to vector<1x128xf32>
    %280 = arith.mulf %278, %279 : vector<1x128xf32>
    %281 = vector.broadcast %280 : vector<1x128xf32> to vector<16x128xf32>
    %282 = arith.subf %274, %281 : vector<16x128xf32>
    %283 = arith.mulf %282, %282 : vector<16x128xf32>
    %284 = vector.broadcast %3 : vector<16x1xf32> to vector<16x128xf32>
    %285 = arith.mulf %283, %284 : vector<16x128xf32>
    %cst_135 = arith.constant dense<0.000000e+00> : vector<128xf32>
    %286 = vector.multi_reduction <add>, %285, %cst_135 [0] : vector<16x128xf32> to vector<128xf32>
    %287 = vector.shape_cast %286 : vector<128xf32> to vector<1x128xf32>
    %cst_136 = arith.constant 6.250000e-02 : f32
    %288 = vector.broadcast %cst_136 : f32 to vector<1x128xf32>
    %289 = arith.mulf %287, %288 : vector<1x128xf32>
    %cst_137 = arith.constant 9.99999974E-6 : f32
    %290 = vector.broadcast %cst_137 : f32 to vector<1x128xf32>
    %291 = arith.addf %289, %290 : vector<1x128xf32>
    %292 = math.rsqrt %291 : vector<1x128xf32>
    %293 = arith.mulf %292, %225 : vector<1x128xf32>
    %294 = vector.broadcast %280 : vector<1x128xf32> to vector<16x128xf32>
    %295 = arith.subf %274, %294 : vector<16x128xf32>
    %296 = vector.broadcast %293 : vector<1x128xf32> to vector<16x128xf32>
    %297 = arith.mulf %295, %296 : vector<16x128xf32>
    %298 = vector.broadcast %227 : vector<1x128xf32> to vector<16x128xf32>
    %299 = arith.addf %297, %298 : vector<16x128xf32>
    %300 = vector.broadcast %3 : vector<16x1xf32> to vector<16x128xf32>
    %301 = arith.mulf %299, %300 : vector<16x128xf32>
    %c0_138 = arith.constant 0 : index
    %c0_139 = arith.constant 0 : index
    %302 = vector.load %arg16[%c0_138, %c0_139] : memref<16x128xf32, #tpu.memory_space<vmem>>, vector<16x128xf32>
    tpu.vector_store %arg16[%c0_138, %c0_139], %301 {strides = array<i32>} : memref<16x128xf32, #tpu.memory_space<vmem>>, vector<16x128xf32>,
    %303 = arith.truncf %301 : vector<16x128xf32> to vector<16x128xbf16>
    %cst_140 = arith.constant dense<0.000000e+00> : vector<8x128xf32>
    %304 = tpu.matmul %27, %303, %cst_140 {dimension_numbers = #tpu.dot_dimension_numbers<[1], [0], [0], [1], [0, 0, 1, 1], [], []>} : vector<8x16xbf16>, vector<16x128xbf16>, vector<8x128xf32> -> vector<8x128xf32>
    %305 = arith.mulf %304, %304 : vector<8x128xf32>
    %cst_141 = arith.constant dense<0.000000e+00> : vector<8xf32>
    %306 = vector.multi_reduction <add>, %305, %cst_141 [1] : vector<8x128xf32> to vector<8xf32>
    %307 = vector.shape_cast %306 : vector<8xf32> to vector<8x1xf32>
    %cst_142 = arith.constant 1.000000e-24 : f32
    %308 = vector.broadcast %cst_142 : f32 to vector<8x1xf32>
    %309 = arith.maximumf %307, %308 : vector<8x1xf32>
    %310 = math.rsqrt %309 : vector<8x1xf32>
    %311 = vector.broadcast %310 : vector<8x1xf32> to vector<8x128xf32>
    %312 = arith.mulf %304, %311 : vector<8x128xf32>
    %c0_143 = arith.constant 0 : index
    %c0_144 = arith.constant 0 : index
    %313 = vector.load %arg15[%c0_143, %c0_144] : memref<8x128xf32, #tpu.memory_space<vmem>>, vector<8x128xf32>
    tpu.vector_store %arg15[%c0_143, %c0_144], %312 {strides = array<i32>} : memref<8x128xf32, #tpu.memory_space<vmem>>, vector<8x128xf32>,
    return
  }
}

</mosaic_0001>

<bundles_post_ra>
// kernel: tpu_custom_call.1
= control target key start
LH: loop header
LB: loop body
LE: loop exit
PB: predicated region body
PF: predicated region fallthrough
CT: control target
= control target key end

     0   :  { %s2511_s0 = inlined_call_operand.vmem [shape: f32[16,128], index: 0, kind: input, shape index: {}]   ;;  %s2512_s1 = inlined_call_operand.vmem [shape: f32[32,128], index: 1, kind: input, shape index: {}]   ;;  %s2513_s2 = inlined_call_operand.vmem [shape: s32[32,1], index: 2, kind: input, shape index: {}]   ;;  %s2514_s3 = inlined_call_operand.vmem [shape: s32[1,32], index: 3, kind: input, shape index: {}]   ;;  %s2515_s4 = inlined_call_operand.vmem [shape: f32[32,1], index: 4, kind: input, shape index: {}]   ;;  %s2516_s5 = inlined_call_operand.vmem [shape: s32[1,16], index: 5, kind: input, shape index: {}]   ;;  %s2517_s6 = inlined_call_operand.vmem [shape: f32[16,1], index: 6, kind: input, shape index: {}]   ;;  %s2518_s7 = inlined_call_operand.hbm [shape: bf16[3,128,128], index: 7, kind: input, shape index: {}]   ;;  %s2519_s8 = inlined_call_operand.vmem [shape: f32[3,1,128], index: 8, kind: input, shape index: {}]   ;;  %s2520_s9 = inlined_call_operand.vmem [shape: f32[3,1,128], index: 9, kind: input, shape index: {}]   ;;  %s2521_s10 = inlined_call_operand.vmem [shape: f32[3,1,128], index: 10, kind: input, shape index: {}]   ;;  %s2522_s11 = inlined_call_operand.hbm [shape: bf16[3,128,128], index: 11, kind: input, shape index: {}]   ;;  %s2523_s12 = inlined_call_operand.vmem [shape: f32[3,1,128], index: 12, kind: input, shape index: {}]   ;;  %s2524_s13 = inlined_call_operand.vmem [shape: f32[3,1,128], index: 13, kind: input, shape index: {}]   ;;  %s2525_s14 = inlined_call_operand.vmem [shape: f32[3,1,128], index: 14, kind: input, shape index: {}]   ;;  %s2526_s15 = inlined_call_operand.hbm [shape: f32[8,128], index: 15, kind: output, shape index: {0}]   ;;  %s2527_s16 = inlined_call_operand.hbm [shape: f32[16,128], index: 16, kind: output, shape index: {1}]  }
   0x1   :  { %2529 = sst [smem:[#allocation14_spill]] %s2511_s0 }
   0x2   :  { %22 = vsyncpa [#allocation3], 0 }
   0x3   :  { %23 = vsyncpa [#allocation6], 0 }
   0x4   :  { %24 = vsyncpa [#allocation4], 0 }
   0x5   :  { %25 = vsyncpa [#allocation9], 0  ;;  %s2050_s21 = smov [#allocation2]   ;;  %s1954_s25 = scalar_lea.hbm %s2518_s7, 3072 }
   0x6   :  { %s45_s22 = sshll.u32 %s2050_s21, 4  ;;  %p1955_p0 = scmp.ne.s32.totalorder %s2518_s7, %s1954_s25  ;;  %s46_s22 = int_to_ptr.vmem [resolvable:$true] %s45_s22 }
   0x7   :  { %p1958_p1 = scmp.lt.u32.totalorder %s1954_s25, %s2518_s7 }
   0x9   :  { %p1960_p2 = pnand %p1958_p1, %p1955_p0 }
   0xb   :  { %1963 = shalt.err (!%p1960_p2)
}
   0xc   :  { %s1964_s30 = scalar_lea.vmem %s46_s22, 3072  ;;  %p1969_p4 = scmp.lt.s32.totalorder %s46_s22, %s46_s22 }
   0xd   :  { %p1965_p3 = scmp.ne.s32.totalorder %s46_s22, %s1964_s30  ;;  %p1970_p5 = scmp.lt.s32.totalorder %s1964_s30, %s1964_s30 }
   0xf   :  { %p1971_p6 = por %p1970_p5, %p1969_p4 }
  0x11   :  { %p1972_p7 = pnand %p1971_p6, %p1965_p3 }
  0x13   :  { %1975 = shalt.err (!%p1972_p7)
}
  0x14   :  { %s2051_s0 = smov 64   ;;  %s2052_s17 = smov 4  }
  0x15   :  { %51 = dma.hbm_to_vmem [thread:$0]  %s2518_s7, 3072, %s46_s22, [#allocation3], %s2051_s0, %s2051_s0, %s2052_s17  }
  0x16   :  { %s2053_s20 = smov [#allocation5]   ;;  %s1976_s25 = scalar_lea.hbm %s2522_s11, 3072 }
  0x17   :  { %s63_s21 = sshll.u32 %s2053_s20, 4  ;;  %p1977_p8 = scmp.ne.s32.totalorder %s2522_s11, %s1976_s25  ;;  %s64_s21 = int_to_ptr.vmem [resolvable:$true] %s63_s21 }
  0x18   :  { %p1980_p9 = scmp.lt.u32.totalorder %s1976_s25, %s2522_s11 }
  0x1a   :  { %p1982_p10 = pnand %p1980_p9, %p1977_p8 }
  0x1c   :  { %1985 = shalt.err (!%p1982_p10)
}
  0x1d   :  { %s1986_s30 = scalar_lea.vmem %s64_s21, 3072  ;;  %p1991_p12 = scmp.lt.s32.totalorder %s64_s21, %s64_s21 }
  0x1e   :  { %p1987_p11 = scmp.ne.s32.totalorder %s64_s21, %s1986_s30  ;;  %p1992_p13 = scmp.lt.s32.totalorder %s1986_s30, %s1986_s30 }
  0x20   :  { %p1993_p0 = por %p1992_p13, %p1991_p12 }
  0x22   :  { %p1994_p1 = pnand %p1993_p0, %p1987_p11 }
  0x24   :  { %1997 = shalt.err (!%p1994_p1)
}
  0x25   :  { %69 = dma.hbm_to_vmem [thread:$0]  %s2522_s11, 3072, %s64_s21, [#allocation6], %s2051_s0, %s2051_s0, %s2052_s17  }
  0x26   :  { %2042 = dma.done.wait [#allocation3], 3072  }
  0x27   :  { %2043 = vsyncadd [#allocation3], 4294964224 }
  0x28   :  { %2044 = dma.done.wait [#allocation6], 3072  }
  0x29   :  { %2045 = vsyncadd [#allocation6], 4294964224  ;;  %v2054_v0 = vmov 0   ;;  %v2055_v1 = vmov 0.0   ;;  %v99_v2 = vld [vmem:[%s2513_s2 + $0x10] sm:$0xff]  ;;  %v97_v3 = vld [vmem:[%s2513_s2] sm:$0xff]  ;;  %v95_v15 = vlaneseq }
  0x2a   :  { %1891 = vset.pattern.permute.xlu1 %v2054_v0  ;;  %1890 = vset.pattern.permute.xlu0 %v2054_v0  ;;  %v100_v4 = vld [vmem:[%s2513_s2 + $0x18] sm:$0xff]  ;;  %v98_v5 = vld [vmem:[%s2513_s2 + $0x8] sm:$0xff]  ;;  %s2530_s26 = sld [smem:[#allocation14_spill]]  ;;  %v89_v9 = vld [vmem:[%s2515_s4] sm:$0xff]  ;;  %vm183_vm4 = vcmask 130048   ;;  %vm2056_vm5 = vmmov 0  }
  0x2b   :  { %1717 = vmatprep.subr.bf16.mxu1 %v2055_v1  ;;  %108 = vperm.xlu1 %1891, %v99_v2   ;;  %v90_v8 = vld [vmem:[%s2515_s4 + $0x8] sm:$0xff]  ;;  %v92_v11 = vld [vmem:[%s2515_s4 + $0x18] sm:$0xff]  ;;  %v91_v12 = vld [vmem:[%s2515_s4 + $0x10] sm:$0xff]  ;;  %v96_v16 = vand.u32 127, %v95_v15  ;;  %v2255_v39 = vshrl.u32 %v95_v15, 7  ;;  %vm269_vm8 = vcmask 261120  }
  0x2c   :  { %102 = vperm.xlu0 %1890, %v97_v3   ;;  %v94_v13 = vld [vmem:[%s2517_s6 + $0x8] sm:$0xff]  ;;  %v93_v14 = vld [vmem:[%s2517_s6] sm:$0xff]  ;;  %1721 = vmatprep.mubr.msk.bf16.mxu1 %vm2056_vm5, %v2055_v1  ;;  %v1894_v29 = vld [vmem:[#allocation2 + $0x10] sm:$0xff]  }
  0x2d   :  { %v1892_v27 = vld [vmem:[#allocation2] sm:$0xff]   ;;  %v1893_v28 = vld [vmem:[#allocation2 + $0x8] sm:$0xff]   ;;  %v1895_v30 = vld [vmem:[#allocation2 + $0x18] sm:$0xff]   ;;  %v125_v51 = vadd.s32 8, %v2255_v39 }
  0x2e   :  { %v1896_v31 = vld [vmem:[#allocation2 + $0x20] sm:$0xff]   ;;  %v1897_v32 = vld [vmem:[#allocation2 + $0x28] sm:$0xff]   ;;  %v2239_v33 = vld [vmem:[%s2512_s1 + $0x10] sm:$0xff] }
  0x2f   :  { %111 = vperm.xlu1 %1891, %v100_v4   ;;  %v2246_v35 = vld [vmem:[%s2512_s1] sm:$0xff]  ;;  %v2253_v38 = vld [vmem:[%s2512_s1 + $0x18] sm:$0xff]  ;;  %v2261_v42 = vld [vmem:[%s2512_s1 + $0x8] sm:$0xff] }
  0x30   :  { %v2186_v6 = vld [vmem:[%s2530_s26] sm:$0xff]  ;;  %v2191_v7 = vld [vmem:[%s2530_s26 + $0x8] sm:$0xff]  ;;  %105 = vperm.xlu0 %1890, %v98_v5   ;;  %v1898_v2 = vld [vmem:[#allocation2 + $0x30] sm:$0xff]  }
  0x31   :  { %v182_v10 = vpack.c.bf16 %v2191_v7, %v2186_v6  ;;  %v1553_v55 = vld [vmem:[%s2514_s3] ss:$0 sm:$0xff]  ;;  %v1899_v3 = vld [vmem:[#allocation2 + $0x38] sm:$0xff]   ;;  %v1902_v15 = vld [vmem:[#allocation5 + $0x10] sm:$0xff]  }
  0x32   :  { %vm131_vm6 = vcmp.eq.s32.totalorder %v2255_v39, %v1553_v55  ;;  %vm132_vm7 = vcmp.eq.s32.totalorder %v125_v51, %v1553_v55 }
  0x33   :  { %1711 = vmatprep.subr.bf16.mxu0 %v182_v10  ;;  %250 = vperm.xlu1 %1891, %v90_v8   ;;  %v133_v62 = vsel %vm131_vm6, 1.0, %v2055_v1  ;;  %v134_v63 = vsel %vm132_vm7, 1.0, %v2055_v1 }
  0x34   :  { %1712 = vmatpush3.bf16.msra.mxu0 %v182_v10  ;;  %245 = vperm.xlu0 %1890, %v89_v9   ;;  %v2282_v0 = vpack.c.bf16 %v134_v63, %v133_v62 }
  0x35   :  { %1725 = vmatprep.subr.bf16.mxu0 %v2055_v1 }
  0x37   :  { %260 = vperm.xlu1 %1891, %v92_v11  }
  0x38   :  { %255 = vperm.xlu0 %1890, %v91_v12  }
  0x3b   :  { %419 = vperm.xlu1 %1891, %v94_v13   ;;  %v1900_v13 = vld [vmem:[#allocation5] sm:$0xff]  }
  0x3c   :  { %414 = vperm.xlu0 %1890, %v93_v14   ;;  %v1901_v14 = vld [vmem:[#allocation5 + $0x8] sm:$0xff]  }
  0xaa   :  { %v109_v17 = vpop.permute.xlu1 %108 }
  0xab   :  { %v103_v18 = vpop.permute.xlu0 %102  ;;  %vm115_vm0 = vcmp.eq.s32.totalorder %v96_v16, %v109_v17  ;;  %v1906_v17 = vld [vmem:[#allocation5 + $0x30] sm:$0xff]  }
  0xac   :  { %vm113_vm1 = vcmp.eq.s32.totalorder %v96_v16, %v103_v18  ;;  %v119_v21 = vsel %vm115_vm0, 1.0, %v2055_v1  ;;  %v1907_v18 = vld [vmem:[#allocation5 + $0x38] sm:$0xff]  }
  0xad   :  { %v117_v22 = vsel %vm113_vm1, 1.0, %v2055_v1 }
  0xae   :  { %v112_v19 = vpop.permute.xlu1 %111 }
  0xaf   :  { %v106_v20 = vpop.permute.xlu0 %105  ;;  %vm116_vm2 = vcmp.eq.s32.totalorder %v96_v16, %v112_v19  ;;  %v1558_v19 = vld [vmem:[%s2519_s8] ss:$0 sm:$0xff] }
  0xb0   :  { %vm114_vm3 = vcmp.eq.s32.totalorder %v96_v16, %v106_v20  ;;  %v120_v23 = vsel %vm116_vm2, 1.0, %v2055_v1  ;;  %v1905_v16 = vld [vmem:[#allocation5 + $0x28] sm:$0xff]  }
  0xb1   :  { %v118_v24 = vsel %vm114_vm3, 1.0, %v2055_v1  ;;  %v2218_v25 = vpack.c.bf16 %v120_v23, %v119_v21 }
  0xb2   :  { %v2220_v26 = vpack.c.bf16 %v118_v24, %v117_v22  ;;  %v2241_v34 = vpop.permute.xlu1 %250 }
  0xb3   :  { %v2248_v36 = vpop.permute.xlu0 %245 }
  0xb4   :  { %1713 = vmatprep.mubr.msk.bf16.mxu0 %vm183_vm4, %v2220_v26 }
  0xb5   :  { %1714 = vmatmul.mubr.msk.bf16.vlgmr.msra.gmra.mrb[0].mxu0 %vm183_vm4, %v2218_v25 }
  0xb6   :  { %1741 = vmatprep.mubr.msk.bf16.mxu0 %vm2056_vm5, %v2055_v1  ;;  %1726 = vmatpush3.bf16.msra.mxu0 %v1892_v27  ;;  %v2267_v52 = vpop.permute.xlu1 %260 }
  0xb7   :  { %1727 = vmatprep.subr.bf16.mxu0 %v2055_v1  ;;  %v2269_v53 = vpop.permute.xlu0 %255 }
  0xba   :  { %1728 = vmatpush3.bf16.msra.mxu0 %v1893_v28  ;;  %v2305_v28 = vpop.permute.xlu1 %419 }
  0xbb   :  { %1729 = vmatprep.subr.bf16.mxu0 %v2055_v1 }
  0xbe   :  { %1730 = vmatpush3.bf16.msra.mxu0 %v1894_v29  ;;  %v2307_v29 = vpop.permute.xlu0 %414 }
  0xbf   :  { %1731 = vmatprep.subr.bf16.mxu0 %v2055_v1 }
  0xc2   :  { %1732 = vmatpush3.bf16.msra.mxu0 %v1895_v30 }
  0xc3   :  { %1733 = vmatprep.subr.bf16.mxu0 %v2055_v1 }
  0xc6   :  { %1734 = vmatpush3.bf16.msra.mxu0 %v1896_v31 }
  0xc7   :  { %1735 = vmatprep.subr.bf16.mxu0 %v2055_v1 }
  0xca   :  { %1736 = vmatpush3.bf16.msra.mxu0 %v1897_v32 }
  0xcb   :  { %1737 = vmatprep.subr.bf16.mxu0 %v2055_v1 }
  0xce   :  { %1738 = vmatpush3.bf16.msra.mxu0 %v1898_v2  ;;  %v177_v2 = vld [vmem:[%s2520_s9] sm:$0x1] }
  0xcf   :  { %1739 = vmatprep.subr.bf16.mxu0 %v2055_v1 }
  0xd2   :  { %1740 = vmatpush3.bf16.msra.mxu0 %v1899_v3  ;;  %v2317_v3 = vsub.s32 0, %v2255_v39 }
 0x188   :  { %v1715_v37 = vpop.f32.mrb[0].mxu0 }
 0x189   :  { %v233_v40 = vadd.f32 %v1715_v37, %v2239_v33  ;;  %v224_v41 = vpop.f32.mrb[1].mxu0 }
 0x18a   :  { %v225_v43 = vadd.f32 %v224_v41, %v2246_v35  ;;  %v1716_v44 = vpop.f32.mrb[2].mxu0 }
 0x18b   :  { %v241_v45 = vmax.f32 %v233_v40, 0.0  ;;  %v236_v46 = vadd.f32 %v1716_v44, %v2253_v38  ;;  %v227_v47 = vpop.f32.mrb[3].mxu0 }
 0x18c   :  { %v239_v48 = vmax.f32 %v225_v43, 0.0  ;;  %v228_v49 = vadd.f32 %v227_v47, %v2261_v42 }
 0x18d   :  { %v242_v50 = vmax.f32 %v236_v46, 0.0  ;;  %v265_v56 = vmul.f32 %v2269_v53, %v241_v45 }
 0x18e   :  { %v240_v54 = vmax.f32 %v228_v49, 0.0  ;;  %v263_v58 = vmul.f32 %v2248_v36, %v239_v48 }
 0x18f   :  { %v266_v57 = vmul.f32 %v2267_v52, %v242_v50 }
 0x190   :  { %v264_v59 = vmul.f32 %v2241_v34, %v240_v54 }
 0x191   :  { %v268_v60 = vpack.c.bf16 %v266_v57, %v265_v56 }
 0x192   :  { %v267_v61 = vpack.c.bf16 %v264_v59, %v263_v58 }
 0x194   :  { %1718 = vmatpush3.bf16.msra.mxu1 %v267_v61 }
 0x195   :  { %1719 = vmatprep.subr.bf16.mxu1 %v2055_v1 }
 0x198   :  { %1720 = vmatpush3.bf16.msra.mxu1 %v268_v60 }
 0x199   :  { %1745 = vmatprep.subr.bf16.mxu1 %v2055_v1 }
 0x19b   :  { %1722 = vmatmul.mubr.msk.bf16.vlgmr.msra.gmra.mrb[0].mxu1 %vm269_vm8, %v2282_v0 }
 0x19c   :  { %1761 = vmatprep.mubr.msk.bf16.mxu1 %vm2056_vm5, %v2055_v1  ;;  %1746 = vmatpush3.bf16.msra.mxu1 %v1900_v13 }
 0x19d   :  { %1747 = vmatprep.subr.bf16.mxu1 %v2055_v1 }
 0x1a0   :  { %1748 = vmatpush3.bf16.msra.mxu1 %v1901_v14 }
 0x1a1   :  { %1749 = vmatprep.subr.bf16.mxu1 %v2055_v1 }
 0x1a4   :  { %1750 = vmatpush3.bf16.msra.mxu1 %v1902_v15 }
 0x1a5   :  { %1751 = vmatprep.subr.bf16.mxu1 %v2055_v1 }
 0x26e   :  { %v307_v4 = vpop.f32.mrb[0].mxu1 }
 0x26f   :  { %v1723_v5 = vpop.f32.mrb[1].mxu1  ;;  %v314_v9 = vadd.f32 %v307_v4, %v2186_v6  ;;  %v1903_v6 = vld [vmem:[#allocation5 + $0x18] sm:$0xff]  }
 0x270   :  { %v310_v8 = vpop.f32.mrb[2].mxu1  ;;  %1752 = vmatpush3.bf16.msra.mxu1 %v1903_v6 }
 0x271   :  { %v315_v10 = vadd.f32 %v310_v8, %v2191_v7  ;;  %v1724_v11 = vpop.f32.mrb[3].mxu1  ;;  %1753 = vmatprep.subr.bf16.mxu1 %v2055_v1  ;;  %v1904_v7 = vld [vmem:[#allocation5 + $0x20] sm:$0xff]  }
 0x273   :  { %v316_v12 = vpack.c.bf16 %v315_v10, %v314_v9  ;;  %v1567_v9 = vld [vmem:[%s2521_s10] ss:$0 sm:$0xff] }
 0x274   :  { %1754 = vmatpush3.bf16.msra.mxu1 %v1904_v7 }
 0x275   :  { %1742 = vmatmul.mubr.bf16.vlgmr.msra.gmra.mrb[4].mxu0 %v316_v12  ;;  %1755 = vmatprep.subr.bf16.mxu1 %v2055_v1 }
 0x276   :  { %1767 = vmatprep.mubr.msk.bf16.mxu0 %vm183_vm4, %v2220_v26 }
 0x278   :  { %1756 = vmatpush3.bf16.msra.mxu1 %v1905_v16 }
 0x279   :  { %1757 = vmatprep.subr.bf16.mxu1 %v2055_v1 }
 0x27c   :  { %1758 = vmatpush3.bf16.msra.mxu1 %v1906_v17  ;;  %v1568_v17 = vld [vmem:[%s2523_s12] ss:$0 sm:$0xff] }
 0x27d   :  { %1759 = vmatprep.subr.bf16.mxu1 %v2055_v1 }
 0x280   :  { %1760 = vmatpush3.bf16.msra.mxu1 %v1907_v18 }
 0x281   :  { %1771 = vmatprep.subr.bf16.mxu1 %v2055_v1 }
 0x348   :  { %v405_v20 = vpop.f32.mrb[4].mxu0 }
 0x349   :  { %v406_v21 = vadd.f32 %v1558_v19, %v405_v20  ;;  %v1743_v22 = vpop.f32.mrb[5].mxu0 }
 0x34a   :  { %v408_v23 = vpop.f32.mrb[6].mxu0 }
 0x34b   :  { %v409_v24 = vadd.f32 %v1558_v19, %v408_v23  ;;  %v1744_v27 = vpop.f32.mrb[7].mxu0  ;;  %v422_v30 = vmul.f32 %v2307_v29, %v406_v21 }
 0x34d   :  { %v423_v31 = vmul.f32 %v2305_v28, %v409_v24 }
 0x34f   :  { %v424_v32 = vadd.f32 %v423_v31, %v422_v30 }
 0x351   :  { %v425_v37 = vrot.slane %v424_v32, 4 }
 0x353   :  { %v426_v40 = vadd.f32 %v425_v37, %v424_v32 }
 0x355   :  { %v427_v41 = vrot.slane %v426_v40, 2 }
 0x357   :  { %v428_v43 = vadd.f32 %v427_v41, %v426_v40 }
 0x359   :  { %v429_v44 = vrot.slane %v428_v43, 1 }
 0x35b   :  { %v430_v45 = vadd.f32 %v429_v44, %v428_v43 }
 0x35d   :  { %v431_v46 = vmul.f32 0.0625, %v430_v45 }
 0x35f   :  { %v432_v47 = vsub.f32 %v406_v21, %v431_v46  ;;  %v433_v48 = vsub.f32 %v409_v24, %v431_v46 }
 0x361   :  { %v434_v49 = vmul.f32 %v432_v47, %v432_v47  ;;  %v435_v50 = vmul.f32 %v433_v48, %v433_v48 }
 0x363   :  { %v436_v51 = vmul.f32 %v434_v49, %v2307_v29  ;;  %v437_v54 = vmul.f32 %v435_v50, %v2305_v28 }
 0x365   :  { %v438_v55 = vadd.f32 %v437_v54, %v436_v51 }
 0x367   :  { %v439_v56 = vrot.slane %v438_v55, 4 }
 0x369   :  { %v440_v57 = vadd.f32 %v439_v56, %v438_v55 }
 0x36b   :  { %v441_v58 = vrot.slane %v440_v57, 2 }
 0x36d   :  { %v442_v59 = vadd.f32 %v441_v58, %v440_v57 }
 0x36f   :  { %v443_v60 = vrot.slane %v442_v59, 1 }
 0x371   :  { %v444_v61 = vadd.f32 %v443_v60, %v442_v59 }
 0x373   :  { %v445_v62 = vmul.f32 0.0625, %v444_v61 }
 0x375   :  { %v446_v63 = vadd.f32 1e-05, %v445_v62  ;;  %v180_v62 = vld [vmem:[%s2524_s13] sm:$0x1] }
 0x377   :  { %1940 = vrsqrt.f32 %v446_v63 }
 0x381   :  { %v1941_v4 = vpop.eup %1940 }
 0x382   :  { %v448_v5 = vmul.f32 %v1941_v4, %v177_v2 }
 0x384   :  { %v452_v8 = vrot.slane %v448_v5, %v2317_v3  ;;  %v1577_v5 = vld [vmem:[%s2525_s14] ss:$0 sm:$0xff] }
 0x386   :  { %v453_v10 = vmul.f32 %v452_v8, %v432_v47  ;;  %v454_v11 = vmul.f32 %v452_v8, %v433_v48 }
 0x388   :  { %v461_v12 = vadd.f32 %v1567_v9, %v453_v10  ;;  %v462_v13 = vadd.f32 %v1567_v9, %v454_v11 }
 0x38a   :  { %v464_v14 = vmul.f32 %v462_v13, %v2305_v28  ;;  %v463_v15 = vmul.f32 %v461_v12, %v2307_v29 }
 0x38c   :  { %v466_v6 = vmax.f32 %v464_v14, 0.0  ;;  %v465_v7 = vmax.f32 %v463_v15, 0.0 }
 0x38e   :  { %v467_v16 = vpack.c.bf16 %v466_v6, %v465_v7  ;;  %v1908_v7 = vld [vmem:[#allocation2 + $0x40] sm:$0xff]  }
 0x390   :  { %1762 = vmatmul.mubr.bf16.vlgmr.msra.gmra.mrb[4].mxu1 %v467_v16  ;;  %v1909_v16 = vld [vmem:[#allocation2 + $0x48] sm:$0xff]  }
 0x391   :  { %1775 = vmatprep.mubr.msk.bf16.mxu1 %vm2056_vm5, %v2055_v1 }
 0x463   :  { %v556_v18 = vpop.f32.mrb[4].mxu1 }
 0x464   :  { %v557_v19 = vadd.f32 %v1568_v17, %v556_v18  ;;  %v1763_v20 = vpop.f32.mrb[5].mxu1  ;;  %v1911_v18 = vld [vmem:[#allocation2 + $0x58] sm:$0xff]  }
 0x465   :  { %v559_v21 = vpop.f32.mrb[6].mxu1  ;;  %v1913_v20 = vld [vmem:[#allocation2 + $0x68] sm:$0xff]  }
 0x466   :  { %v560_v22 = vadd.f32 %v1568_v17, %v559_v21  ;;  %v1764_v23 = vpop.f32.mrb[7].mxu1  ;;  %v563_v24 = vmul.f32 %v557_v19, %v2307_v29  ;;  %v1910_v17 = vld [vmem:[#allocation2 + $0x50] sm:$0xff]  }
 0x468   :  { %v564_v27 = vmul.f32 %v560_v22, %v2305_v28 }
 0x46a   :  { %v565_v30 = vadd.f32 %v564_v27, %v563_v24 }
 0x46c   :  { %v566_v31 = vrot.slane %v565_v30, 4 }
 0x46e   :  { %v567_v32 = vadd.f32 %v566_v31, %v565_v30 }
 0x470   :  { %v568_v37 = vrot.slane %v567_v32, 2 }
 0x472   :  { %v569_v40 = vadd.f32 %v568_v37, %v567_v32 }
 0x474   :  { %v570_v41 = vrot.slane %v569_v40, 1 }
 0x476   :  { %v571_v43 = vadd.f32 %v570_v41, %v569_v40 }
 0x478   :  { %v572_v44 = vmul.f32 0.0625, %v571_v43 }
 0x47a   :  { %v573_v45 = vsub.f32 %v557_v19, %v572_v44  ;;  %v574_v46 = vsub.f32 %v560_v22, %v572_v44  ;;  %v1912_v19 = vld [vmem:[#allocation2 + $0x60] sm:$0xff]  }
 0x47c   :  { %v575_v47 = vmul.f32 %v573_v45, %v573_v45  ;;  %v576_v48 = vmul.f32 %v574_v46, %v574_v46 }
 0x47e   :  { %v577_v49 = vmul.f32 %v575_v47, %v2307_v29  ;;  %v578_v50 = vmul.f32 %v576_v48, %v2305_v28 }
 0x480   :  { %v579_v51 = vadd.f32 %v578_v50, %v577_v49  ;;  %v1914_v50 = vld [vmem:[#allocation2 + $0x70] sm:$0xff]  }
 0x482   :  { %v580_v54 = vrot.slane %v579_v51, 4 }
 0x484   :  { %v581_v55 = vadd.f32 %v580_v54, %v579_v51  ;;  %v1915_v51 = vld [vmem:[#allocation2 + $0x78] sm:$0xff]  }
 0x486   :  { %v582_v56 = vrot.slane %v581_v55, 2 }
 0x488   :  { %v583_v57 = vadd.f32 %v582_v56, %v581_v55 }
 0x48a   :  { %v584_v58 = vrot.slane %v583_v57, 1 }
 0x48c   :  { %v585_v59 = vadd.f32 %v584_v58, %v583_v57 }
 0x48e   :  { %v586_v60 = vmul.f32 0.0625, %v585_v59 }
 0x490   :  { %v587_v61 = vadd.f32 1e-05, %v586_v60 }
 0x492   :  { %1942 = vrsqrt.f32 %v587_v61  ;;  %v1916_v61 = vld [vmem:[#allocation5 + $0x40] sm:$0xff]  }
 0x49c   :  { %v1943_v63 = vpop.eup %1942 }
 0x49d   :  { %v589_v2 = vmul.f32 %v1943_v63, %v180_v62  ;;  %v1917_v62 = vld [vmem:[#allocation5 + $0x48] sm:$0xff]   ;;  %v1918_v63 = vld [vmem:[#allocation5 + $0x50] sm:$0xff]  }
 0x49f   :  { %v593_v4 = vrot.slane %v589_v2, %v2317_v3  ;;  %v1919_v2 = vld [vmem:[#allocation5 + $0x58] sm:$0xff]  }
 0x4a1   :  { %v594_v8 = vmul.f32 %v593_v4, %v573_v45  ;;  %v595_v9 = vmul.f32 %v593_v4, %v574_v46  ;;  %v1920_v4 = vld [vmem:[#allocation5 + $0x60] sm:$0xff]  }
 0x4a3   :  { %v603_v10 = vadd.f32 %v1577_v5, %v595_v9  ;;  %v602_v11 = vadd.f32 %v1577_v5, %v594_v8  ;;  %v1922_v5 = vld [vmem:[#allocation5 + $0x70] sm:$0xff]   ;;  %v1923_v8 = vld [vmem:[#allocation5 + $0x78] sm:$0xff]   ;;  %v1587_v9 = vld [vmem:[%s2519_s8 + $0x1] ss:$0 sm:$0xff] }
 0x4a5   :  { %v604_v12 = vmul.f32 %v602_v11, %v2307_v29  ;;  %v605_v13 = vmul.f32 %v603_v10, %v2305_v28 }
 0x4a7   :  { %v606_v14 = vmax.f32 %v604_v12, 0.0  ;;  %v607_v15 = vmax.f32 %v605_v13, 0.0 }
 0x4a9   :  { %v654_v6 = vpack.c.bf16 %v607_v15, %v606_v14 }
 0x4ab   :  { %1765 = vmatprep.subr.bf16.mxu0 %v654_v6 }
 0x4ac   :  { %1766 = vmatpush3.bf16.msra.mxu0 %v654_v6 }
 0x4ad   :  { %1779 = vmatprep.subr.bf16.mxu0 %v2055_v1 }
 0x4af   :  { %1768 = vmatmul.mubr.msk.bf16.vlgmr.msra.gmra.mrb[8].mxu0 %vm183_vm4, %v2218_v25 }
 0x4b0   :  { %1795 = vmatprep.mubr.msk.bf16.mxu0 %vm2056_vm5, %v2055_v1  ;;  %1780 = vmatpush3.bf16.msra.mxu0 %v1908_v7 }
 0x4b1   :  { %1781 = vmatprep.subr.bf16.mxu0 %v2055_v1 }
 0x4b4   :  { %1782 = vmatpush3.bf16.msra.mxu0 %v1909_v16 }
 0x4b5   :  { %1783 = vmatprep.subr.bf16.mxu0 %v2055_v1 }
 0x4b8   :  { %1784 = vmatpush3.bf16.msra.mxu0 %v1910_v17 }
 0x4b9   :  { %1785 = vmatprep.subr.bf16.mxu0 %v2055_v1 }
 0x4bc   :  { %1786 = vmatpush3.bf16.msra.mxu0 %v1911_v18 }
 0x4bd   :  { %1787 = vmatprep.subr.bf16.mxu0 %v2055_v1 }
 0x4c0   :  { %1788 = vmatpush3.bf16.msra.mxu0 %v1912_v19 }
 0x4c1   :  { %1789 = vmatprep.subr.bf16.mxu0 %v2055_v1 }
 0x4c4   :  { %1790 = vmatpush3.bf16.msra.mxu0 %v1913_v20 }
 0x4c5   :  { %1791 = vmatprep.subr.bf16.mxu0 %v2055_v1 }
 0x4c8   :  { %1792 = vmatpush3.bf16.msra.mxu0 %v1914_v50  ;;  %v1579_v50 = vld [vmem:[%s2520_s9 + $0x1] sm:$0x1] }
 0x4c9   :  { %1793 = vmatprep.subr.bf16.mxu0 %v2055_v1 }
 0x4cc   :  { %1794 = vmatpush3.bf16.msra.mxu0 %v1915_v51 }
 0x582   :  { %v1769_v21 = vpop.f32.mrb[8].mxu0 }
 0x583   :  { %v698_v22 = vadd.f32 %v1769_v21, %v2239_v33  ;;  %v689_v23 = vpop.f32.mrb[9].mxu0 }
 0x584   :  { %v690_v24 = vadd.f32 %v689_v23, %v2246_v35  ;;  %v1770_v27 = vpop.f32.mrb[10].mxu0 }
 0x585   :  { %v706_v30 = vmax.f32 %v698_v22, 0.0  ;;  %v701_v31 = vadd.f32 %v1770_v27, %v2253_v38  ;;  %v692_v32 = vpop.f32.mrb[11].mxu0 }
 0x586   :  { %v704_v37 = vmax.f32 %v690_v24, 0.0  ;;  %v693_v40 = vadd.f32 %v692_v32, %v2261_v42 }
 0x587   :  { %v707_v41 = vmax.f32 %v701_v31, 0.0  ;;  %v710_v44 = vmul.f32 %v706_v30, %v2269_v53 }
 0x588   :  { %v705_v43 = vmax.f32 %v693_v40, 0.0  ;;  %v708_v46 = vmul.f32 %v704_v37, %v2248_v36 }
 0x589   :  { %v711_v45 = vmul.f32 %v707_v41, %v2267_v52 }
 0x58a   :  { %v709_v47 = vmul.f32 %v705_v43, %v2241_v34 }
 0x58b   :  { %v713_v48 = vpack.c.bf16 %v711_v45, %v710_v44 }
 0x58c   :  { %v712_v49 = vpack.c.bf16 %v709_v47, %v708_v46 }
 0x58e   :  { %1772 = vmatpush3.bf16.msra.mxu1 %v712_v49 }
 0x58f   :  { %1773 = vmatprep.subr.bf16.mxu1 %v2055_v1 }
 0x592   :  { %1774 = vmatpush3.bf16.msra.mxu1 %v713_v48 }
 0x593   :  { %1799 = vmatprep.subr.bf16.mxu1 %v2055_v1 }
 0x595   :  { %1776 = vmatmul.mubr.msk.bf16.vlgmr.msra.gmra.mrb[8].mxu1 %vm269_vm8, %v2282_v0 }
 0x596   :  { %1815 = vmatprep.mubr.msk.bf16.mxu1 %vm2056_vm5, %v2055_v1  ;;  %1800 = vmatpush3.bf16.msra.mxu1 %v1916_v61 }
 0x597   :  { %1801 = vmatprep.subr.bf16.mxu1 %v2055_v1 }
 0x59a   :  { %1802 = vmatpush3.bf16.msra.mxu1 %v1917_v62 }
 0x59b   :  { %1803 = vmatprep.subr.bf16.mxu1 %v2055_v1 }
 0x59e   :  { %1804 = vmatpush3.bf16.msra.mxu1 %v1918_v63 }
 0x59f   :  { %1805 = vmatprep.subr.bf16.mxu1 %v2055_v1 }
 0x5a2   :  { %1806 = vmatpush3.bf16.msra.mxu1 %v1919_v2 }
 0x5a3   :  { %1807 = vmatprep.subr.bf16.mxu1 %v2055_v1 }
 0x5a6   :  { %1808 = vmatpush3.bf16.msra.mxu1 %v1920_v4 }
 0x5a7   :  { %1809 = vmatprep.subr.bf16.mxu1 %v2055_v1 }
 0x668   :  { %v748_v54 = vpop.f32.mrb[8].mxu1 }
 0x669   :  { %v1777_v55 = vpop.f32.mrb[9].mxu1  ;;  %v755_v57 = vadd.f32 %v748_v54, %v606_v14 }
 0x66a   :  { %v751_v56 = vpop.f32.mrb[10].mxu1 }
 0x66b   :  { %v756_v58 = vadd.f32 %v751_v56, %v607_v15  ;;  %v1778_v59 = vpop.f32.mrb[11].mxu1  ;;  %v1596_v56 = vld [vmem:[%s2521_s10 + $0x1] ss:$0 sm:$0xff] }
 0x66d   :  { %v757_v60 = vpack.c.bf16 %v756_v58, %v755_v57 }
 0x66f   :  { %1796 = vmatmul.mubr.bf16.vlgmr.msra.gmra.mrb[12].mxu0 %v757_v60 }
 0x670   :  { %1821 = vmatprep.mubr.msk.bf16.mxu0 %vm183_vm4, %v2220_v26  ;;  %v1921_v26 = vld [vmem:[#allocation5 + $0x68] sm:$0xff]  }
 0x671   :  { %1810 = vmatpush3.bf16.msra.mxu1 %v1921_v26  ;;  %v1597_v26 = vld [vmem:[%s2523_s12 + $0x1] ss:$0 sm:$0xff] }
 0x672   :  { %1811 = vmatprep.subr.bf16.mxu1 %v2055_v1 }
 0x675   :  { %1812 = vmatpush3.bf16.msra.mxu1 %v1922_v5 }
 0x676   :  { %1813 = vmatprep.subr.bf16.mxu1 %v2055_v1 }
 0x679   :  { %1814 = vmatpush3.bf16.msra.mxu1 %v1923_v8 }
 0x67a   :  { %1825 = vmatprep.subr.bf16.mxu1 %v2055_v1 }
 0x742   :  { %v846_v10 = vpop.f32.mrb[12].mxu0 }
 0x743   :  { %v847_v11 = vadd.f32 %v1587_v9, %v846_v10  ;;  %v1797_v12 = vpop.f32.mrb[13].mxu0 }
 0x744   :  { %v849_v13 = vpop.f32.mrb[14].mxu0 }
 0x745   :  { %v850_v14 = vadd.f32 %v1587_v9, %v849_v13  ;;  %v1798_v15 = vpop.f32.mrb[15].mxu0  ;;  %v853_v6 = vmul.f32 %v847_v11, %v2307_v29 }
 0x747   :  { %v854_v7 = vmul.f32 %v850_v14, %v2305_v28 }
 0x749   :  { %v855_v16 = vadd.f32 %v854_v7, %v853_v6 }
 0x74b   :  { %v856_v17 = vrot.slane %v855_v16, 4 }
 0x74d   :  { %v857_v18 = vadd.f32 %v856_v17, %v855_v16 }
 0x74f   :  { %v858_v19 = vrot.slane %v857_v18, 2 }
 0x751   :  { %v859_v20 = vadd.f32 %v858_v19, %v857_v18 }
 0x753   :  { %v860_v21 = vrot.slane %v859_v20, 1 }
 0x755   :  { %v861_v22 = vadd.f32 %v860_v21, %v859_v20 }
 0x757   :  { %v862_v23 = vmul.f32 0.0625, %v861_v22 }
 0x759   :  { %v863_v24 = vsub.f32 %v847_v11, %v862_v23  ;;  %v864_v27 = vsub.f32 %v850_v14, %v862_v23 }
 0x75b   :  { %v865_v30 = vmul.f32 %v863_v24, %v863_v24  ;;  %v866_v31 = vmul.f32 %v864_v27, %v864_v27 }
 0x75d   :  { %v867_v32 = vmul.f32 %v865_v30, %v2307_v29  ;;  %v868_v37 = vmul.f32 %v866_v31, %v2305_v28 }
 0x75f   :  { %v869_v40 = vadd.f32 %v868_v37, %v867_v32 }
 0x761   :  { %v870_v41 = vrot.slane %v869_v40, 4 }
 0x763   :  { %v871_v43 = vadd.f32 %v870_v41, %v869_v40 }
 0x765   :  { %v872_v44 = vrot.slane %v871_v43, 2 }
 0x767   :  { %v873_v45 = vadd.f32 %v872_v44, %v871_v43 }
 0x769   :  { %v874_v46 = vrot.slane %v873_v45, 1 }
 0x76b   :  { %v875_v47 = vadd.f32 %v874_v46, %v873_v45 }
 0x76d   :  { %v876_v48 = vmul.f32 0.0625, %v875_v47  ;;  %v1582_v47 = vld [vmem:[%s2524_s13 + $0x1] sm:$0x1] }
 0x76f   :  { %v877_v49 = vadd.f32 1e-05, %v876_v48 }
 0x771   :  { %1944 = vrsqrt.f32 %v877_v49 }
 0x77b   :  { %v1945_v51 = vpop.eup %1944 }
 0x77c   :  { %v879_v54 = vmul.f32 %v1945_v51, %v1579_v50  ;;  %v1606_v51 = vld [vmem:[%s2525_s14 + $0x1] ss:$0 sm:$0xff] }
 0x77e   :  { %v883_v55 = vrot.slane %v879_v54, %v2317_v3 }
 0x780   :  { %v884_v57 = vmul.f32 %v883_v55, %v863_v24  ;;  %v885_v58 = vmul.f32 %v883_v55, %v864_v27 }
 0x782   :  { %v892_v59 = vadd.f32 %v1596_v56, %v884_v57  ;;  %v893_v60 = vadd.f32 %v1596_v56, %v885_v58 }
 0x784   :  { %v895_v61 = vmul.f32 %v893_v60, %v2305_v28  ;;  %v894_v62 = vmul.f32 %v892_v59, %v2307_v29 }
 0x786   :  { %v897_v63 = vmax.f32 %v895_v61, 0.0  ;;  %v896_v2 = vmax.f32 %v894_v62, 0.0 }
 0x788   :  { %v898_v4 = vpack.c.bf16 %v897_v63, %v896_v2  ;;  %v1924_v63 = vld [vmem:[#allocation2 + $0x80] sm:$0xff]   ;;  %v1925_v2 = vld [vmem:[#allocation2 + $0x88] sm:$0xff]  }
 0x78a   :  { %1816 = vmatmul.mubr.bf16.vlgmr.msra.gmra.mrb[12].mxu1 %v898_v4  ;;  %v1926_v4 = vld [vmem:[#allocation2 + $0x90] sm:$0xff]  }
 0x78b   :  { %1829 = vmatprep.mubr.msk.bf16.mxu1 %vm2056_vm5, %v2055_v1 }
 0x85d   :  { %v987_v5 = vpop.f32.mrb[12].mxu1 }
 0x85e   :  { %v988_v8 = vadd.f32 %v1597_v26, %v987_v5  ;;  %v1817_v9 = vpop.f32.mrb[13].mxu1  ;;  %v1928_v5 = vld [vmem:[#allocation2 + $0xa0] sm:$0xff]  }
 0x85f   :  { %v990_v10 = vpop.f32.mrb[14].mxu1 }
 0x860   :  { %v991_v11 = vadd.f32 %v1597_v26, %v990_v10  ;;  %v1818_v12 = vpop.f32.mrb[15].mxu1  ;;  %v994_v13 = vmul.f32 %v988_v8, %v2307_v29  ;;  %v1927_v26 = vld [vmem:[#allocation2 + $0x98] sm:$0xff]  }
 0x862   :  { %v995_v14 = vmul.f32 %v991_v11, %v2305_v28 }
 0x864   :  { %v996_v15 = vadd.f32 %v995_v14, %v994_v13 }
 0x866   :  { %v997_v6 = vrot.slane %v996_v15, 4 }
 0x868   :  { %v998_v7 = vadd.f32 %v997_v6, %v996_v15 }
 0x86a   :  { %v999_v16 = vrot.slane %v998_v7, 2 }
 0x86c   :  { %v1000_v17 = vadd.f32 %v999_v16, %v998_v7 }
 0x86e   :  { %v1001_v18 = vrot.slane %v1000_v17, 1 }
 0x870   :  { %v1002_v19 = vadd.f32 %v1001_v18, %v1000_v17 }
 0x872   :  { %v1003_v20 = vmul.f32 0.0625, %v1002_v19 }
 0x874   :  { %v1004_v21 = vsub.f32 %v988_v8, %v1003_v20  ;;  %v1005_v22 = vsub.f32 %v991_v11, %v1003_v20 }
 0x876   :  { %v1006_v23 = vmul.f32 %v1004_v21, %v1004_v21  ;;  %v1007_v24 = vmul.f32 %v1005_v22, %v1005_v22 }
 0x878   :  { %v1008_v27 = vmul.f32 %v1006_v23, %v2307_v29  ;;  %v1009_v30 = vmul.f32 %v1007_v24, %v2305_v28 }
 0x87a   :  { %v1010_v31 = vadd.f32 %v1009_v30, %v1008_v27  ;;  %v1933_v27 = vld [vmem:[#allocation5 + $0x88] sm:$0xff]   ;;  %v1934_v30 = vld [vmem:[#allocation5 + $0x90] sm:$0xff]  }
 0x87c   :  { %v1011_v32 = vrot.slane %v1010_v31, 4 }
 0x87e   :  { %v1012_v37 = vadd.f32 %v1011_v32, %v1010_v31  ;;  %v1935_v31 = vld [vmem:[#allocation5 + $0x98] sm:$0xff]   ;;  %v1936_v32 = vld [vmem:[#allocation5 + $0xa0] sm:$0xff]  }
 0x880   :  { %v1013_v40 = vrot.slane %v1012_v37, 2 }
 0x882   :  { %v1014_v41 = vadd.f32 %v1013_v40, %v1012_v37  ;;  %v1937_v37 = vld [vmem:[#allocation5 + $0xa8] sm:$0xff]   ;;  %v1938_v40 = vld [vmem:[#allocation5 + $0xb0] sm:$0xff]  }
 0x884   :  { %v1015_v43 = vrot.slane %v1014_v41, 1 }
 0x886   :  { %v1016_v44 = vadd.f32 %v1015_v43, %v1014_v41  ;;  %v1939_v41 = vld [vmem:[#allocation5 + $0xb8] sm:$0xff]   ;;  %v1616_v43 = vld [vmem:[%s2519_s8 + $0x2] ss:$0 sm:$0xff] }
 0x888   :  { %v1017_v45 = vmul.f32 0.0625, %v1016_v44 }
 0x88a   :  { %v1018_v46 = vadd.f32 1e-05, %v1017_v45 }
 0x88c   :  { %1946 = vrsqrt.f32 %v1018_v46 }
 0x896   :  { %v1947_v48 = vpop.eup %1946 }
 0x897   :  { %v1020_v49 = vmul.f32 %v1947_v48, %v1582_v47 }
 0x899   :  { %v1024_v50 = vrot.slane %v1020_v49, %v2317_v3 }
 0x89b   :  { %v1025_v54 = vmul.f32 %v1024_v50, %v1004_v21  ;;  %v1026_v55 = vmul.f32 %v1024_v50, %v1005_v22 }
 0x89d   :  { %v1034_v56 = vadd.f32 %v1606_v51, %v1026_v55  ;;  %v1033_v57 = vadd.f32 %v1606_v51, %v1025_v54 }
 0x89f   :  { %v1035_v58 = vmul.f32 %v1033_v57, %v2307_v29  ;;  %v1036_v59 = vmul.f32 %v1034_v56, %v2305_v28 }
 0x8a1   :  { %v1037_v60 = vmax.f32 %v1035_v58, 0.0  ;;  %v1038_v61 = vmax.f32 %v1036_v59, 0.0 }
 0x8a3   :  { %v1085_v62 = vpack.c.bf16 %v1038_v61, %v1037_v60 }
 0x8a5   :  { %1819 = vmatprep.subr.bf16.mxu0 %v1085_v62 }
 0x8a6   :  { %1820 = vmatpush3.bf16.msra.mxu0 %v1085_v62 }
 0x8a7   :  { %1833 = vmatprep.subr.bf16.mxu0 %v2055_v1 }
 0x8a9   :  { %1822 = vmatmul.mubr.msk.bf16.vlgmr.msra.gmra.mrb[16].mxu0 %vm183_vm4, %v2218_v25  ;;  %v1929_v25 = vld [vmem:[#allocation2 + $0xa8] sm:$0xff]  }
 0x8aa   :  { %1849 = vmatprep.mubr.msk.bf16.mxu0 %vm2056_vm5, %v2055_v1  ;;  %1834 = vmatpush3.bf16.msra.mxu0 %v1924_v63 }
 0x8ab   :  { %1835 = vmatprep.subr.bf16.mxu0 %v2055_v1 }
 0x8ae   :  { %1836 = vmatpush3.bf16.msra.mxu0 %v1925_v2 }
 0x8af   :  { %1837 = vmatprep.subr.bf16.mxu0 %v2055_v1 }
 0x8b2   :  { %1838 = vmatpush3.bf16.msra.mxu0 %v1926_v4 }
 0x8b3   :  { %1839 = vmatprep.subr.bf16.mxu0 %v2055_v1 }
 0x8b6   :  { %1840 = vmatpush3.bf16.msra.mxu0 %v1927_v26 }
 0x8b7   :  { %1841 = vmatprep.subr.bf16.mxu0 %v2055_v1 }
 0x8ba   :  { %1842 = vmatpush3.bf16.msra.mxu0 %v1928_v5 }
 0x8bb   :  { %1843 = vmatprep.subr.bf16.mxu0 %v2055_v1 }
 0x8be   :  { %1844 = vmatpush3.bf16.msra.mxu0 %v1929_v25 }
 0x8bf   :  { %1845 = vmatprep.subr.bf16.mxu0 %v2055_v1 }
 0x97c   :  { %v1823_v8 = vpop.f32.mrb[16].mxu0 }
 0x97d   :  { %v1129_v9 = vadd.f32 %v1823_v8, %v2239_v33  ;;  %v1120_v10 = vpop.f32.mrb[17].mxu0 }
 0x97e   :  { %v1121_v11 = vadd.f32 %v1120_v10, %v2246_v35  ;;  %v1824_v12 = vpop.f32.mrb[18].mxu0 }
 0x97f   :  { %v1137_v13 = vmax.f32 %v1129_v9, 0.0  ;;  %v1132_v14 = vadd.f32 %v1824_v12, %v2253_v38  ;;  %v1123_v15 = vpop.f32.mrb[19].mxu0  ;;  %v1930_v38 = vld [vmem:[#allocation2 + $0xb0] sm:$0xff]  }
 0x980   :  { %v1135_v6 = vmax.f32 %v1121_v11, 0.0  ;;  %v1124_v7 = vadd.f32 %v1123_v15, %v2261_v42  ;;  %1846 = vmatpush3.bf16.msra.mxu0 %v1930_v38 }
 0x981   :  { %v1138_v16 = vmax.f32 %v1132_v14, 0.0  ;;  %v1141_v18 = vmul.f32 %v1137_v13, %v2269_v53  ;;  %1847 = vmatprep.subr.bf16.mxu0 %v2055_v1 }
 0x982   :  { %v1136_v17 = vmax.f32 %v1124_v7, 0.0  ;;  %v1139_v20 = vmul.f32 %v1135_v6, %v2248_v36  ;;  %v1931_v36 = vld [vmem:[#allocation2 + $0xb8] sm:$0xff]   ;;  %v1608_v6 = vld [vmem:[%s2520_s9 + $0x2] sm:$0x1] }
 0x983   :  { %v1142_v19 = vmul.f32 %v1138_v16, %v2267_v52 }
 0x984   :  { %v1140_v33 = vmul.f32 %v1136_v17, %v2241_v34  ;;  %1848 = vmatpush3.bf16.msra.mxu0 %v1931_v36 }
 0x985   :  { %v1144_v21 = vpack.c.bf16 %v1142_v19, %v1141_v18  ;;  %1873 = vmatprep.subr.bf16.mxu0 %v2055_v1  ;;  %v1625_v18 = vld [vmem:[%s2521_s10 + $0x2] ss:$0 sm:$0xff] }
 0x986   :  { %v1143_v35 = vpack.c.bf16 %v1140_v33, %v1139_v20 }
 0x988   :  { %1826 = vmatpush3.bf16.msra.mxu1 %v1143_v35 }
 0x989   :  { %1827 = vmatprep.subr.bf16.mxu1 %v2055_v1 }
 0x98c   :  { %1828 = vmatpush3.bf16.msra.mxu1 %v1144_v21 }
 0x98d   :  { %1853 = vmatprep.subr.bf16.mxu1 %v2055_v1 }
 0x98f   :  { %1830 = vmatmul.mubr.msk.bf16.vlgmr.msra.gmra.mrb[16].mxu1 %vm269_vm8, %v2282_v0  ;;  %v1932_v0 = vld [vmem:[#allocation5 + $0x80] sm:$0xff]  }
 0x990   :  { %1869 = vmatprep.mubr.msk.bf16.mxu1 %vm2056_vm5, %v2055_v1  ;;  %1854 = vmatpush3.bf16.msra.mxu1 %v1932_v0 }
 0x991   :  { %1855 = vmatprep.subr.bf16.mxu1 %v2055_v1 }
 0x994   :  { %1856 = vmatpush3.bf16.msra.mxu1 %v1933_v27 }
 0x995   :  { %1857 = vmatprep.subr.bf16.mxu1 %v2055_v1 }
 0x998   :  { %1858 = vmatpush3.bf16.msra.mxu1 %v1934_v30 }
 0x999   :  { %1859 = vmatprep.subr.bf16.mxu1 %v2055_v1 }
 0x99c   :  { %1860 = vmatpush3.bf16.msra.mxu1 %v1935_v31 }
 0x99d   :  { %1861 = vmatprep.subr.bf16.mxu1 %v2055_v1 }
 0x9a0   :  { %1862 = vmatpush3.bf16.msra.mxu1 %v1936_v32 }
 0x9a1   :  { %1863 = vmatprep.subr.bf16.mxu1 %v2055_v1 }
 0x9a4   :  { %1864 = vmatpush3.bf16.msra.mxu1 %v1937_v37 }
 0x9a5   :  { %1865 = vmatprep.subr.bf16.mxu1 %v2055_v1 }
 0x9a8   :  { %1866 = vmatpush3.bf16.msra.mxu1 %v1938_v40 }
 0x9a9   :  { %1867 = vmatprep.subr.bf16.mxu1 %v2055_v1 }
 0x9ac   :  { %1868 = vmatpush3.bf16.msra.mxu1 %v1939_v41 }
 0xa62   :  { %v1179_v34 = vpop.f32.mrb[16].mxu1 }
 0xa63   :  { %v1831_v42 = vpop.f32.mrb[17].mxu1  ;;  %v1186_v53 = vadd.f32 %v1179_v34, %v1037_v60 }
 0xa64   :  { %v1182_v52 = vpop.f32.mrb[18].mxu1 }
 0xa65   :  { %v1187_v22 = vadd.f32 %v1182_v52, %v1038_v61  ;;  %v1832_v23 = vpop.f32.mrb[19].mxu1  ;;  %v1626_v52 = vld [vmem:[%s2523_s12 + $0x2] ss:$0 sm:$0xff] }
 0xa67   :  { %v1188_v24 = vpack.c.bf16 %v1187_v22, %v1186_v53 }
 0xa69   :  { %1850 = vmatmul.mubr.bf16.vlgmr.msra.gmra.mrb[20].mxu0 %v1188_v24 }
 0xa6a   :  { %1875 = vmatprep.mubr.msk.bf16.mxu0 %vm2056_vm5, %v2055_v1 }
 0xb3c   :  { %v1277_v44 = vpop.f32.mrb[20].mxu0 }
 0xb3d   :  { %v1278_v45 = vadd.f32 %v1616_v43, %v1277_v44  ;;  %v1851_v46 = vpop.f32.mrb[21].mxu0 }
 0xb3e   :  { %v1280_v47 = vpop.f32.mrb[22].mxu0 }
 0xb3f   :  { %v1281_v48 = vadd.f32 %v1616_v43, %v1280_v47  ;;  %v1852_v49 = vpop.f32.mrb[23].mxu0  ;;  %v1284_v50 = vmul.f32 %v1278_v45, %v2307_v29 }
 0xb41   :  { %v1285_v51 = vmul.f32 %v1281_v48, %v2305_v28 }
 0xb43   :  { %v1286_v54 = vadd.f32 %v1285_v51, %v1284_v50 }
 0xb45   :  { %v1287_v55 = vrot.slane %v1286_v54, 4 }
 0xb47   :  { %v1288_v56 = vadd.f32 %v1287_v55, %v1286_v54 }
 0xb49   :  { %v1289_v57 = vrot.slane %v1288_v56, 2 }
 0xb4b   :  { %v1290_v58 = vadd.f32 %v1289_v57, %v1288_v56 }
 0xb4d   :  { %v1291_v59 = vrot.slane %v1290_v58, 1 }
 0xb4f   :  { %v1292_v60 = vadd.f32 %v1291_v59, %v1290_v58 }
 0xb51   :  { %v1293_v61 = vmul.f32 0.0625, %v1292_v60 }
 0xb53   :  { %v1294_v62 = vsub.f32 %v1278_v45, %v1293_v61  ;;  %v1295_v63 = vsub.f32 %v1281_v48, %v1293_v61 }
 0xb55   :  { %v1296_v2 = vmul.f32 %v1294_v62, %v1294_v62  ;;  %v1297_v4 = vmul.f32 %v1295_v63, %v1295_v63 }
 0xb57   :  { %v1298_v26 = vmul.f32 %v1296_v2, %v2307_v29  ;;  %v1299_v5 = vmul.f32 %v1297_v4, %v2305_v28  ;;  %v1611_v2 = vld [vmem:[%s2524_s13 + $0x2] sm:$0x1] }
 0xb59   :  { %v1300_v25 = vadd.f32 %v1299_v5, %v1298_v26 }
 0xb5b   :  { %v1301_v8 = vrot.slane %v1300_v25, 4 }
 0xb5d   :  { %v1302_v9 = vadd.f32 %v1301_v8, %v1300_v25  ;;  %v1554_v25 = vld [vmem:[%s2516_s5] ss:$0 sm:$0xff]  ;;  %v1635_v8 = vld [vmem:[%s2525_s14 + $0x2] ss:$0 sm:$0xff]  ;;  %s2057_s5 = smov [#allocation8]  }
 0xb5e   :  { %vm141_vm9 = vcmp.eq.s32.totalorder %v2255_v39, %v1554_v25  ;;  %s1536_s13 = sshll.u32 %s2057_s5, 4  ;;  %s1537_s13 = int_to_ptr.vmem [resolvable:$true] %s1536_s13 }
 0xb5f   :  { %v1303_v10 = vrot.slane %v1302_v9, 2  ;;  %s1998_s14 = scalar_lea.vmem %s1537_s13, 256  ;;  %p2003_p3 = scmp.lt.s32.totalorder %s1537_s13, %s1537_s13 }
 0xb60   :  { %p1999_p2 = scmp.ne.s32.totalorder %s1537_s13, %s1998_s14  ;;  %p2004_p4 = scmp.lt.s32.totalorder %s1998_s14, %s1998_s14 }
 0xb61   :  { %v1304_v11 = vadd.f32 %v1303_v10, %v1302_v9 }
 0xb62   :  { %p2005_p5 = por %p2004_p4, %p2003_p3 }
 0xb63   :  { %v1305_v12 = vrot.slane %v1304_v11, 1 }
 0xb64   :  { %p2006_p6 = pnand %p2005_p5, %p1999_p2 }
 0xb65   :  { %v1306_v13 = vadd.f32 %v1305_v12, %v1304_v11 }
 0xb67   :  { %v1307_v14 = vmul.f32 0.0625, %v1306_v13 }
 0xb69   :  { %v1308_v15 = vadd.f32 1e-05, %v1307_v14 }
 0xb6b   :  { %1948 = vrsqrt.f32 %v1308_v15 }
 0xb75   :  { %v1949_v7 = vpop.eup %1948 }
 0xb76   :  { %v1310_v16 = vmul.f32 %v1949_v7, %v1608_v6 }
 0xb78   :  { %v1314_v17 = vrot.slane %v1310_v16, %v2317_v3 }
 0xb7a   :  { %v1315_v19 = vmul.f32 %v1314_v17, %v1294_v62  ;;  %v1316_v20 = vmul.f32 %v1314_v17, %v1295_v63 }
 0xb7c   :  { %v1323_v33 = vadd.f32 %v1625_v18, %v1315_v19  ;;  %v1324_v21 = vadd.f32 %v1625_v18, %v1316_v20 }
 0xb7e   :  { %v1326_v35 = vmul.f32 %v1324_v21, %v2305_v28  ;;  %v1325_v38 = vmul.f32 %v1323_v33, %v2307_v29 }
 0xb80   :  { %v1328_v36 = vmax.f32 %v1326_v35, 0.0  ;;  %v1327_v34 = vmax.f32 %v1325_v38, 0.0 }
 0xb82   :  { %v1329_v42 = vpack.c.bf16 %v1328_v36, %v1327_v34 }
 0xb84   :  { %1870 = vmatmul.mubr.bf16.vlgmr.msra.gmra.mrb[20].mxu1 %v1329_v42 }
 0xc57   :  { %v1418_v53 = vpop.f32.mrb[20].mxu1 }
 0xc58   :  { %v1419_v22 = vadd.f32 %v1626_v52, %v1418_v53  ;;  %v1871_v23 = vpop.f32.mrb[21].mxu1 }
 0xc59   :  { %v1421_v24 = vpop.f32.mrb[22].mxu1 }
 0xc5a   :  { %v1422_v0 = vadd.f32 %v1626_v52, %v1421_v24  ;;  %v1872_v27 = vpop.f32.mrb[23].mxu1  ;;  %v1425_v30 = vmul.f32 %v1419_v22, %v2307_v29 }
 0xc5c   :  { %v1426_v31 = vmul.f32 %v1422_v0, %v2305_v28 }
 0xc5e   :  { %v1427_v32 = vadd.f32 %v1426_v31, %v1425_v30 }
 0xc60   :  { %v1428_v37 = vrot.slane %v1427_v32, 4 }
 0xc62   :  { %v1429_v40 = vadd.f32 %v1428_v37, %v1427_v32 }
 0xc64   :  { %v1430_v41 = vrot.slane %v1429_v40, 2 }
 0xc66   :  { %v1431_v43 = vadd.f32 %v1430_v41, %v1429_v40 }
 0xc68   :  { %v1432_v44 = vrot.slane %v1431_v43, 1 }
 0xc6a   :  { %v1433_v45 = vadd.f32 %v1432_v44, %v1431_v43 }
 0xc6c   :  { %v1434_v46 = vmul.f32 0.0625, %v1433_v45 }
 0xc6e   :  { %v1435_v47 = vsub.f32 %v1419_v22, %v1434_v46  ;;  %v1436_v48 = vsub.f32 %v1422_v0, %v1434_v46 }
 0xc70   :  { %v1437_v49 = vmul.f32 %v1435_v47, %v1435_v47  ;;  %v1438_v50 = vmul.f32 %v1436_v48, %v1436_v48 }
 0xc72   :  { %v1439_v51 = vmul.f32 %v1437_v49, %v2307_v29  ;;  %v1440_v54 = vmul.f32 %v1438_v50, %v2305_v28 }
 0xc74   :  { %v1441_v55 = vadd.f32 %v1440_v54, %v1439_v51 }
 0xc76   :  { %v1442_v56 = vrot.slane %v1441_v55, 4 }
 0xc78   :  { %v1443_v57 = vadd.f32 %v1442_v56, %v1441_v55 }
 0xc7a   :  { %v1444_v58 = vrot.slane %v1443_v57, 2 }
 0xc7c   :  { %v1445_v59 = vadd.f32 %v1444_v58, %v1443_v57 }
 0xc7e   :  { %v1446_v60 = vrot.slane %v1445_v59, 1 }
 0xc80   :  { %v1447_v61 = vadd.f32 %v1446_v60, %v1445_v59 }
 0xc82   :  { %v1448_v62 = vmul.f32 0.0625, %v1447_v61 }
 0xc84   :  { %v1449_v63 = vadd.f32 1e-05, %v1448_v62 }
 0xc86   :  { %1950 = vrsqrt.f32 %v1449_v63 }
 0xc90   :  { %v1951_v4 = vpop.eup %1950 }
 0xc91   :  { %v1451_v26 = vmul.f32 %v1951_v4, %v1611_v2 }
 0xc93   :  { %v1455_v5 = vrot.slane %v1451_v26, %v2317_v3  ;;  %v142_v3 = vsel %vm141_vm9, 1.0, %v2055_v1 }
 0xc94   :  { %v143_v6 = vpack.c.bf16 %v142_v3, %v142_v3 }
 0xc95   :  { %v1456_v9 = vmul.f32 %v1455_v5, %v1435_v47  ;;  %v1457_v10 = vmul.f32 %v1455_v5, %v1436_v48 }
 0xc97   :  { %v1464_v11 = vadd.f32 %v1635_v8, %v1456_v9  ;;  %v1465_v12 = vadd.f32 %v1635_v8, %v1457_v10 }
 0xc99   :  { %v1467_v13 = vmul.f32 %v1465_v12, %v2305_v28  ;;  %v1466_v14 = vmul.f32 %v1464_v11, %v2307_v29 }
 0xc9b   :  { %1469 = vst [vmem:[#allocation8 + $0x8] sm:$0xff] %v1467_v13  ;;  %v1470_v15 = vpack.c.bf16 %v1467_v13, %v1466_v14  ;;  %1468 = vst [vmem:[#allocation8] sm:$0xff] %v1466_v14 }
 0xc9d   :  { %1874 = vmatpush3.bf16.msra.mxu0 %v1470_v15 }
 0xca0   :  { %1876 = vmatmul.mubr.msk.bf16.vlgmr.msra.gmra.mrb[24].mxu0 %vm183_vm4, %v143_v6 }
 0xd73   :  { %v1508_v7 = vpop.f32.mrb[24].mxu0 }
 0xd74   :  { %v1514_v16 = vmul.f32 %v1508_v7, %v1508_v7  ;;  %v1877_v17 = vpop.f32.mrb[25].mxu0 }
 0xd75   :  { %v1511_v18 = vpop.f32.mrb[26].mxu0 }
 0xd76   :  { %1515 = vadd.xlane.f32.xlu0 %v1514_v16  ;;  %v1878_v39 = vpop.f32.mrb[27].mxu0 }
 0xd77   :  { %2009 = shalt.err (!%p2006_p6)
}
 0xd78   :  { %s2010_s21 = scalar_lea.hbm %s2527_s16, 256 }
 0xd79   :  { %p2011_p7 = scmp.ne.s32.totalorder %s2527_s16, %s2010_s21  ;;  %p2014_p8 = scmp.lt.u32.totalorder %s2010_s21, %s2527_s16 }
 0xd7b   :  { %p2016_p9 = pnand %p2014_p8, %p2011_p7 }
 0xd7d   :  { %2019 = shalt.err (!%p2016_p9)
}
 0xd7e   :  { %s2058_s28 = smov 128   ;;  %s2059_s1 = smov 8  }
 0xd7f   :  { %1542 = dma.vmem_to_hbm [thread:$0]  %s1537_s13, 256, %s2527_s16, [#allocation9], %s2058_s28, %s2058_s28, %s2059_s1  }
 0xd80   :  { %s2060_s30 = smov [#allocation7]  }
 0xd81   :  { %s1527_s7 = sshll.u32 %s2060_s30, 4  ;;  %s1528_s7 = int_to_ptr.vmem [resolvable:$true] %s1527_s7 }
 0xd82   :  { %s2020_s22 = scalar_lea.vmem %s1528_s7, 128  ;;  %p2025_p11 = scmp.lt.s32.totalorder %s1528_s7, %s1528_s7 }
 0xd83   :  { %p2021_p10 = scmp.ne.s32.totalorder %s1528_s7, %s2020_s22  ;;  %p2026_p12 = scmp.lt.s32.totalorder %s2020_s22, %s2020_s22 }
 0xd85   :  { %p2027_p13 = por %p2026_p12, %p2025_p11 }
 0xd87   :  { %p2028_p0 = pnand %p2027_p13, %p2021_p10 }
 0xe03   :  { %v1516_v1 = vpop.xlane.xlu0 %1515 }
 0xe04   :  { %v1517_v28 = vmax.f32 %v1516_v1, 1e-24 }
 0xe06   :  { %1952 = vrsqrt.f32 %v1517_v28 }
 0xe10   :  { %v1953_v29 = vpop.eup %1952 }
 0xe11   :  { %v1519_v19 = vmul.f32 %v1953_v29, %v1508_v7 }
 0xe13   :  { %1520 = vst [vmem:[#allocation7] sm:$0xff] %v1519_v19 }
 0xe14   :  { %2031 = shalt.err (!%p2028_p0)
}
 0xe15   :  { %s2032_s16 = scalar_lea.hbm %s2526_s15, 128 }
 0xe16   :  { %p2033_p1 = scmp.ne.s32.totalorder %s2526_s15, %s2032_s16  ;;  %p2036_p2 = scmp.lt.u32.totalorder %s2032_s16, %s2526_s15 }
 0xe18   :  { %p2038_p3 = pnand %p2036_p2, %p2033_p1 }
 0xe1a   :  { %2041 = shalt.err (!%p2038_p3)
}
 0xe1b   :  { %1530 = dma.vmem_to_hbm [thread:$0]  %s1528_s7, 128, %s2526_s15, [#allocation4]  }
 0xe1c   :  { %2046 = dma.done.wait [#allocation4], 128  }
 0xe1d   :  { %2047 = vsyncadd [#allocation4], 4294967168 }
 0xe1e   :  { %2048 = dma.done.wait [#allocation9], 256  }
 0xe1f   :  { %2049 = vsyncadd [#allocation9], 4294967040 }
 0xe20   :  { %1549 = vsyncpa [#allocation3], 1 }
 0xe21   :  { %1550 = vsyncpa [#allocation6], 1 }
 0xe22   :  { %1551 = vsyncpa [#allocation4], 1 }
 0xe23   :  { %1552 = vsyncpa [#allocation9], 1 }

</bundles_post_ra>
